<compile_context>
chip_gen: v7x
topology: tpu7x:2x2x1
jax: 0.10.0
libtpu: 0.0.40
codegen_flags: <defaults>
</compile_context>

<pallas_src>
import functools
import numpy as np
import jax
import jax.numpy as jnp
from jax import lax
from jax.experimental import pallas as pl
from jax.experimental.pallas import tpu as pltpu

_VMEM_LIMIT = 48 * 1024 * 1024   # safe on v5e/v6e (128 MiB) and v7x (64 MiB)
_EXACT_SOFTMAX_DIV = False       # True -> exact division (closer to PyTorch ref)


def _round_up(x, m):
    return (x + m - 1) // m * m


# -----------------------------------------------------------------------------
# In-kernel math helpers (f32 VPU/EUP math)
# -----------------------------------------------------------------------------
def _layernorm(x, gamma, beta, eps=1e-5):
    mu = jnp.mean(x, axis=-1, keepdims=True)
    var = jnp.mean((x - mu) ** 2, axis=-1, keepdims=True)
    return (x - mu) * lax.rsqrt(var + eps) * gamma + beta


def _gelu_tanh(x):
    # tanh approximation of GELU: goes to the EUP (separate bundle slot) instead
    # of a multi-term erf polynomial on the VPU.
    # TODO(synk): nn.GELU default is the exact erf form; this deviates at ~1e-3.
    c0 = jnp.float32(0.7978845608028654)   # sqrt(2/pi)
    c1 = jnp.float32(0.044715)
    return 0.5 * x * (1.0 + jnp.tanh(c0 * (x + c1 * x * x * x)))


# -----------------------------------------------------------------------------
# Pallas kernels
# -----------------------------------------------------------------------------
def _tokenize_kernel(p_ref, w_ref, b_ref, base_ref, o_ref, *, n_real):
    # Patch projection fused with cls-token / positional-embedding / padding
    # assembly.  p_ref[0] is (n_pad, Kp_pad) with zero rows at the cls slot
    # (row 0) and at the padded tail; base_ref holds cls+pos[0] in row 0,
    # pos[1:n_real] in rows 1..n_real-1 and zeros elsewhere.
    n_pad = base_ref.shape[0]
    t = jnp.dot(p_ref[0], w_ref[...], preferred_element_type=jnp.float32)  # (n_pad, D)
    rows = lax.broadcasted_iota(jnp.int32, (n_pad, 1), 0)
    is_tok = jnp.logical_and(rows >= 1, rows < n_real)
    o_ref[0] = base_ref[...] + jnp.where(is_tok, t + b_ref[...], jnp.float32(0.0))


def _backbone_kernel(x_ref, g1_ref, bt1_ref, wqkv_ref, wproj_ref, bproj_ref,
                     g2_ref, bt2_ref, w1_ref, b1_ref, w2_ref, b2_ref, o_ref,
                     ctx_ref, *, num_heads, n_real):
    d = pl.program_id(1)

    # Bring the assembled sequence into the carry once per batch element.  The
    # output block index does not depend on d, so o_ref stays VMEM-resident
    # across the whole depth loop and is written back to HBM once per b.
    @pl.when(d == 0)
    def _():
        o_ref[0] = x_ref[0]

    x = o_ref[0]                                   # (n_pad, D) f32
    n_pad, D = x.shape
    hd = D // num_heads

    # ---- attention: LN -> QKV -> masked softmax per head -> ONE fused projection
    y = _layernorm(x, g1_ref[0], bt1_ref[0]).astype(jnp.bfloat16)
    qkv = jnp.dot(y, wqkv_ref[0], preferred_element_type=jnp.float32)    # (n_pad, 3D)

    # mask zero-padded sequence positions when they act as keys
    key_ids = lax.broadcasted_iota(jnp.int32, (n_pad, n_pad), 1)
    key_valid = key_ids < n_real

    for h in range(num_heads):                     # static unroll
        q = qkv[:, h * hd:(h + 1) * hd].astype(jnp.bfloat16)            # qk scale folded
        k = qkv[:, D + h * hd:D + (h + 1) * hd].astype(jnp.bfloat16)
        v = qkv[:, 2 * D + h * hd:2 * D + (h + 1) * hd].astype(jnp.bfloat16)
        s = lax.dot_general(q, k, (((1,), (1,)), ((), ())),
                            preferred_element_type=jnp.float32)         # (n_pad, n_pad)
        s = jnp.where(key_valid, s, jnp.float32(-1e30))
        s = s - jnp.max(s, axis=-1, keepdims=True)
        p = jnp.exp(s)
        denom = jnp.sum(p, axis=-1, keepdims=True)
        if _EXACT_SOFTMAX_DIV:
            p = p / denom
        else:
            p = p * pl.reciprocal(denom, approx=True)
        ctx_ref[:, h * hd:(h + 1) * hd] = jnp.dot(
            p.astype(jnp.bfloat16), v, preferred_element_type=jnp.float32
        ).astype(jnp.bfloat16)

    # single K=D output projection (fills MXU depth vs num_heads K=hd matmuls)
    attn = (jnp.dot(ctx_ref[...], wproj_ref[0], preferred_element_type=jnp.float32)
            + bproj_ref[0])
    x1 = x + attn                                   # residual (fused)

    # ---- MLP: LN -> fc1 -> GELU(tanh, EUP) -> fc2; residual fused into store ----
    z = _layernorm(x1, g2_ref[0], bt2_ref[0]).astype(jnp.bfloat16)
    h1 = jnp.dot(z, w1_ref[0], preferred_element_type=jnp.float32) + b1_ref[0]
    h1 = _gelu_tanh(h1).astype(jnp.bfloat16)
    m = jnp.dot(h1, w2_ref[0], preferred_element_type=jnp.float32) + b2_ref[0]

    o_ref[0] = x1 + m


def _norm_head_kernel(x_ref, g_ref, b_ref, wh_ref, bh_ref, o_ref):
    # final LayerNorm + classification head (head output padded to 128 lanes)
    y = _layernorm(x_ref[...], g_ref[...], b_ref[...]).astype(jnp.bfloat16)
    o_ref[...] = (jnp.dot(y, wh_ref[...], preferred_element_type=jnp.float32)
                  + bh_ref[...])


# -----------------------------------------------------------------------------
# Pallas wrappers
# -----------------------------------------------------------------------------
def pallas_tokenize(patches_pad, proj_w, proj_b, seq_base, n_real):
    B, n_pad, Kp = patches_pad.shape
    D = proj_w.shape[1]
    kernel = functools.partial(_tokenize_kernel, n_real=n_real)
    return pl.pallas_call(
        kernel,
        out_shape=jax.ShapeDtypeStruct((B, n_pad, D), jnp.float32),
        grid=(B,),
        in_specs=[pl.BlockSpec((1, n_pad, Kp), lambda b: (b, 0, 0)),
                  pl.BlockSpec((Kp, D), lambda b: (0, 0)),
                  pl.BlockSpec((1, D), lambda b: (0, 0)),
                  pl.BlockSpec((n_pad, D), lambda b: (0, 0))],
        out_specs=pl.BlockSpec((1, n_pad, D), lambda b: (b, 0, 0)),
        compiler_params=pltpu.CompilerParams(
            dimension_semantics=("parallel",),
            vmem_limit_bytes=_VMEM_LIMIT),
    )(patches_pad, proj_w, proj_b, seq_base)


def pallas_backbone(xseq, blocks, num_heads, n_real):
    B, n_pad, D = xseq.shape
    depth = blocks["wqkv"].shape[0]
    H = blocks["w1"].shape[2]
    kernel = functools.partial(_backbone_kernel, num_heads=num_heads, n_real=n_real)

    def wspec(shape):
        # depth-indexed weight block: prefetched while the previous block computes
        return pl.BlockSpec((1,) + tuple(shape[1:]), lambda b, d: (d, 0, 0))

    return pl.pallas_call(
        kernel,
        out_shape=jax.ShapeDtypeStruct((B, n_pad, D), jnp.float32),
        grid=(B, depth),
        in_specs=[pl.BlockSpec((1, n_pad, D), lambda b, d: (b, 0, 0)),
                  wspec((depth, 1, D)), wspec((depth, 1, D)),
                  wspec((depth, D, 3 * D)),
                  wspec((depth, D, D)), wspec((depth, 1, D)),
                  wspec((depth, 1, D)), wspec((depth, 1, D)),
                  wspec((depth, D, H)), wspec((depth, 1, H)),
                  wspec((depth, H, D)), wspec((depth, 1, D))],
        out_specs=pl.BlockSpec((1, n_pad, D), lambda b, d: (b, 0, 0)),
        scratch_shapes=[pltpu.VMEM((n_pad, D), jnp.bfloat16)],   # head-context buffer
        input_output_aliases={0: 0},        # donate the activation buffer
        compiler_params=pltpu.CompilerParams(
            dimension_semantics=("parallel", "arbitrary"),
            vmem_limit_bytes=_VMEM_LIMIT),
    )(xseq, blocks["g1"], blocks["bt1"], blocks["wqkv"], blocks["wproj"],
      blocks["bproj"], blocks["g2"], blocks["bt2"], blocks["w1"], blocks["b1"],
      blocks["w2"], blocks["b2"])


def pallas_norm_head(x_cls, gamma, beta, wh_b16, bh):
    B, D = x_cls.shape
    Pp = wh_b16.shape[1]                      # padded to a multiple of 128 lanes
    return pl.pallas_call(
        _norm_head_kernel,
        out_shape=jax.ShapeDtypeStruct((B, Pp), jnp.float32),
        grid=(1,),
        in_specs=[pl.BlockSpec((B, D), lambda i: (0, 0)),
                  pl.BlockSpec((1, D), lambda i: (0, 0)),
                  pl.BlockSpec((1, D), lambda i: (0, 0)),
                  pl.BlockSpec((D, Pp), lambda i: (0, 0)),
                  pl.BlockSpec((1, Pp), lambda i: (0, 0))],
        out_specs=pl.BlockSpec((B, Pp), lambda i: (0, 0)),
        compiler_params=pltpu.CompilerParams(vmem_limit_bytes=_VMEM_LIMIT),
    )(x_cls, gamma, beta, wh_b16, bh)


# -----------------------------------------------------------------------------
# Model: parameter init + prep + forward
# -----------------------------------------------------------------------------
def get_sinusoid_encoding(num_tokens, token_len):
    pos = np.arange(num_tokens)[:, None]
    j = np.arange(token_len)[None, :]
    angle = pos / np.power(10000.0, 2 * (j // 2) / token_len)
    table = np.zeros((num_tokens, token_len), dtype=np.float32)
    table[:, 0::2] = np.sin(angle[:, 0::2])
    table[:, 1::2] = np.cos(angle[:, 1::2])
    return jnp.asarray(table)[None, :, :]     # (1, num_tokens, token_len)


def init_params(key, *, img_size, patch_size, token_len, preds, num_heads,
                hidden_chan_mul, depth):
    C, H, W = img_size
    patch_dim = C * patch_size * patch_size
    D = token_len
    hidden = int(D * hidden_chan_mul)
    num_tokens = (H // patch_size) * (W // patch_size)

    def normal(k, shape):
        return 0.02 * jax.random.normal(k, shape, dtype=jnp.float32)

    keys = jax.random.split(key, 4 + depth)
    params = {
        "proj_w": normal(keys[0], (patch_dim, D)),     # stored as (in, out)
        "proj_b": jnp.zeros((1, D), jnp.float32),
        # TODO(synk): PyTorch uses trunc_normal_ for cls_token; plain normal used here.
        "cls_token": normal(keys[1], (1, 1, D)),
        "pos_embed": get_sinusoid_encoding(num_tokens + 1, D),
        "final_g": jnp.ones((1, D), jnp.float32),
        "final_b": jnp.zeros((1, D), jnp.float32),
        "head_w": normal(keys[2], (D, preds)),
        "head_b": jnp.zeros((1, preds), jnp.float32),
        "blocks": [],
    }
    for i in range(depth):
        bk = jax.random.split(keys[4 + i], 4)
        params["blocks"].append({
            "g1": jnp.ones((1, D), jnp.float32),
            "bt1": jnp.zeros((1, D), jnp.float32),
            "wqkv": normal(bk[0], (D, 3 * D)),          # qkv_bias=False
            "wproj": normal(bk[1], (D, D)),
            "bproj": jnp.zeros((1, D), jnp.float32),
            "g2": jnp.ones((1, D), jnp.float32),
            "bt2": jnp.zeros((1, D), jnp.float32),
            "w1": normal(bk[2], (D, hidden)),
            "b1": jnp.zeros((1, hidden), jnp.float32),
            "w2": normal(bk[3], (hidden, D)),
            "b2": jnp.zeros((1, D), jnp.float32),
        })
    return params


def prepare_params(params, *, num_heads, preds):
    """One-time transform: fold qk scale into the Q columns of wqkv, cast matmul
    weights to bf16 (MXU native), stack per-block weights over a depth axis,
    pre-assemble the cls+pos "seq_base" slab, pad the patch dim and the head
    output to lane multiples."""
    Kp, D = params["proj_w"].shape
    head_dim = D // num_heads
    scale = jnp.float32(head_dim ** -0.5)

    n_real = params["pos_embed"].shape[1]
    n_pad = _round_up(n_real, 8)
    Kp_pad = _round_up(Kp, 128)

    proj_w = jnp.zeros((Kp_pad, D), jnp.float32).at[:Kp].set(params["proj_w"])

    # seq_base: row 0 = cls + pos[0]; rows 1..n_real-1 = pos[1:]; padded rows = 0
    pos = params["pos_embed"][0]                       # (n_real, D)
    cls = params["cls_token"][0, 0]                    # (D,)
    seq_base = jnp.zeros((n_pad, D), jnp.float32)
    seq_base = seq_base.at[:n_real].set(pos)
    seq_base = seq_base.at[0].add(cls)

    Pp = _round_up(max(preds, 1), 128)
    head_w = jnp.zeros((D, Pp), jnp.float32).at[:, :preds].set(params["head_w"])
    head_b = jnp.zeros((1, Pp), jnp.float32).at[:, :preds].set(params["head_b"])

    def stack(name):
        return jnp.stack([blk[name] for blk in params["blocks"]], axis=0)

    wqkv = stack("wqkv")
    wqkv = wqkv.at[:, :, :D].multiply(scale)           # fold attention scale into Q

    blocks = {
        "g1": stack("g1"), "bt1": stack("bt1"),
        "wqkv": wqkv.astype(jnp.bfloat16),
        "wproj": stack("wproj").astype(jnp.bfloat16),
        "bproj": stack("bproj"),
        "g2": stack("g2"), "bt2": stack("bt2"),
        "w1": stack("w1").astype(jnp.bfloat16), "b1": stack("b1"),
        "w2": stack("w2").astype(jnp.bfloat16), "b2": stack("b2"),
    }

    return {
        "proj_w": proj_w.astype(jnp.bfloat16),
        "proj_b": params["proj_b"],
        "seq_base": seq_base,
        "final_g": params["final_g"], "final_b": params["final_b"],
        "head_w": head_w.astype(jnp.bfloat16), "head_b": head_b,
        "blocks": blocks,
    }


def vit_forward(prepared, x, *, patch_size, num_heads, preds):
    # x: (B, C, H, W)  -- NCHW, matching PyTorch
    B, C, H, W = x.shape
    p = patch_size
    gh, gw = H // p, W // p
    n_real = gh * gw + 1
    n_pad = prepared["seq_base"].shape[0]
    Kp_pad = prepared["proj_w"].shape[0]
    D = prepared["proj_w"].shape[1]

    # nn.Unfold(kernel=p, stride=p).transpose(2, 1): (B, L, C*p*p) in (c,di,dj) order
    patches = x.reshape(B, C, gh, p, gw, p).transpose(0, 2, 4, 1, 3, 5)
    patches = patches.reshape(B, gh * gw, C * p * p)
    # place patch rows at sequence slots 1..L, zero the cls slot / padded rows /
    # padded patch-dim lanes; cls token, pos-embed and bias are applied in-kernel.
    patches_pad = jnp.pad(
        patches, ((0, 0), (1, n_pad - n_real), (0, Kp_pad - patches.shape[-1]))
    ).astype(jnp.bfloat16)

    # fused: patch projection + cls concat + positional embedding + padding
    xseq = pallas_tokenize(patches_pad, prepared["proj_w"], prepared["proj_b"],
                           prepared["seq_base"], n_real)

    # depth-fused encoder stack (single pallas_call, activation resident in VMEM).
    # NOTE: padded rows (>= n_real) are masked as keys and never read at the head.
    xseq = pallas_backbone(xseq, prepared["blocks"], num_heads, n_real)

    # final norm + head on the cls token (LayerNorm is per-token, so norming the
    # cls token alone is equivalent to norming the full sequence then slicing)
    out = pallas_norm_head(xseq[:, 0, :], prepared["final_g"], prepared["final_b"],
                           prepared["head_w"], prepared["head_b"])
    return out[:, :preds]      # slice the padded 128-lane head output back to preds


# -----------------------------------------------------------------------------
if __name__ == "__main__":
    # Small config consistent with ViT_Model(img_size=(C,H,W), patch_size, ...)
    img_size = (1, 32, 32)
    patch_size = 16          # -> 4 patch tokens, sequence 5 (with cls), padded to 8
    token_len = 128          # multiple of 128: lane-dense D
    preds = 1                # head output padded to 128 lanes in-kernel
    num_heads = 1
    hidden_chan_mul = 4.0    # hidden = 512, multiple of 128
    depth = 2
    batch = 2

    key = jax.random.PRNGKey(0)
    pkey, xkey = jax.random.split(key)
    raw = init_params(pkey, img_size=img_size, patch_size=patch_size,
                      token_len=token_len, preds=preds, num_heads=num_heads,
                      hidden_chan_mul=hidden_chan_mul, depth=depth)
    params = prepare_params(raw, num_heads=num_heads, preds=preds)

    x = jax.random.normal(xkey, (batch,) + img_size, dtype=jnp.float32)  # NCHW

    fwd = jax.jit(functools.partial(vit_forward, patch_size=patch_size,
                                    num_heads=num_heads, preds=preds))
    out = fwd(params, x)
    jax.block_until_ready(out)
    assert out.shape == (batch, preds)
    assert bool(jnp.all(jnp.isfinite(out)))
    print("KERNEL_OK")
</pallas_src>

<mosaic_0001>
module attributes {stable_mosaic.version = 11 : i64} {
  func.func @_tokenize_kernel(%arg0: i32, %arg1: memref<1x8x256xbf16, #tpu.memory_space<vmem>>, %arg2: memref<256x128xbf16, #tpu.memory_space<vmem>>, %arg3: memref<1x128xf32, #tpu.memory_space<vmem>>, %arg4: memref<8x128xf32, #tpu.memory_space<vmem>>, %arg5: memref<1x8x128xf32, #tpu.memory_space<vmem>>) attributes {dimension_semantics = [#tpu.dimension_semantics<parallel>], iteration_bounds = array<i64: 2>, scalar_prefetch = 0 : i64, scratch_operands = 0 : i64, tpu.core_type = #tpu.core_type<tc>, window_params = [{transform_indices = @transform_0, window_bounds = array<i64: 1, 8, 256>}, {pipeline_mode = #tpu.pipeline_mode<synchronous>, transform_indices = @transform_1, window_bounds = array<i64: 256, 128>}, {pipeline_mode = #tpu.pipeline_mode<synchronous>, transform_indices = @transform_2, window_bounds = array<i64: 1, 128>}, {pipeline_mode = #tpu.pipeline_mode<synchronous>, transform_indices = @transform_3, window_bounds = array<i64: 8, 128>}, {transform_indices = @transform_4, window_bounds = array<i64: 1, 8, 128>}]} {
    %c0 = arith.constant 0 : index
    %c0_0 = arith.constant 0 : index
    %c0_1 = arith.constant 0 : index
    %0 = vector.load %arg1[%c0, %c0_0, %c0_1] : memref<1x8x256xbf16, #tpu.memory_space<vmem>>, vector<1x8x256xbf16>
    %1 = vector.shape_cast %0 : vector<1x8x256xbf16> to vector<8x256xbf16>
    %c0_2 = arith.constant 0 : index
    %c0_3 = arith.constant 0 : index
    %2 = vector.load %arg2[%c0_2, %c0_3] : memref<256x128xbf16, #tpu.memory_space<vmem>>, vector<256x128xbf16>
    %cst = arith.constant dense<0.000000e+00> : vector<8x128xf32>
    %3 = tpu.matmul %1, %2, %cst {dimension_numbers = #tpu.dot_dimension_numbers<[1], [0], [0], [1], [0, 0, 1, 1], [], []>} : vector<8x256xbf16>, vector<256x128xbf16>, vector<8x128xf32> -> vector<8x128xf32>
    %4 = tpu.iota {dimensions = array<i32: 0>} : vector<8x1xi32>
    %c1_i32 = arith.constant 1 : i32
    %5 = vector.broadcast %c1_i32 : i32 to vector<8x1xi32>
    %6 = arith.cmpi sge, %4, %5 : vector<8x1xi32>
    %c5_i32 = arith.constant 5 : i32
    %7 = vector.broadcast %c5_i32 : i32 to vector<8x1xi32>
    %8 = arith.cmpi slt, %4, %7 : vector<8x1xi32>
    %9 = arith.andi %6, %8 : vector<8x1xi1>
    %c0_4 = arith.constant 0 : index
    %c0_5 = arith.constant 0 : index
    %10 = vector.load %arg4[%c0_4, %c0_5] : memref<8x128xf32, #tpu.memory_space<vmem>>, vector<8x128xf32>
    %c0_6 = arith.constant 0 : index
    %c0_7 = arith.constant 0 : index
    %11 = vector.load %arg3[%c0_6, %c0_7] : memref<1x128xf32, #tpu.memory_space<vmem>>, vector<1x128xf32>
    %12 = vector.broadcast %11 : vector<1x128xf32> to vector<8x128xf32>
    %13 = arith.addf %3, %12 : vector<8x128xf32>
    %cst_8 = arith.constant 0.000000e+00 : f32
    %14 = vector.shape_cast %9 : vector<8x1xi1> to vector<8x1xi1>
    %15 = vector.broadcast %14 : vector<8x1xi1> to vector<8x128xi1>
    %16 = vector.broadcast %cst_8 : f32 to vector<8x128xf32>
    %17 = arith.select %15, %13, %16 : vector<8x128xi1>, vector<8x128xf32>
    %18 = arith.addf %10, %17 : vector<8x128xf32>
    %c0_9 = arith.constant 0 : index
    %c0_10 = arith.constant 0 : index
    %c0_11 = arith.constant 0 : index
    %19 = vector.load %arg5[%c0_9, %c0_10, %c0_11] : memref<1x8x128xf32, #tpu.memory_space<vmem>>, vector<1x8x128xf32>
    %20 = vector.shape_cast %19 : vector<1x8x128xf32> to vector<8x128xf32>
    %21 = vector.shape_cast %18 : vector<8x128xf32> to vector<1x8x128xf32>
    tpu.vector_store %arg5[%c0_9, %c0_10, %c0_11], %21 {strides = array<i32>} : memref<1x8x128xf32, #tpu.memory_space<vmem>>, vector<1x8x128xf32>,
    return
  }
  func.func @transform_0(%arg0: i32) -> (i32, i32, i32) {
    %c0_i32 = arith.constant 0 : i32
    %c0_i32_0 = arith.constant 0 : i32
    %c0_i32_1 = arith.constant 0 : i32
    return %arg0, %c0_i32, %c0_i32_0 : i32, i32, i32
  }
  func.func @transform_1(%arg0: i32) -> (i32, i32) {
    %c0_i32 = arith.constant 0 : i32
    %c0_i32_0 = arith.constant 0 : i32
    %c0_i32_1 = arith.constant 0 : i32
    return %c0_i32, %c0_i32_0 : i32, i32
  }
  func.func @transform_2(%arg0: i32) -> (i32, i32) {
    %c0_i32 = arith.constant 0 : i32
    %c0_i32_0 = arith.constant 0 : i32
    %c0_i32_1 = arith.constant 0 : i32
    return %c0_i32, %c0_i32_0 : i32, i32
  }
  func.func @transform_3(%arg0: i32) -> (i32, i32) {
    %c0_i32 = arith.constant 0 : i32
    %c0_i32_0 = arith.constant 0 : i32
    %c0_i32_1 = arith.constant 0 : i32
    return %c0_i32, %c0_i32_0 : i32, i32
  }
  func.func @transform_4(%arg0: i32) -> (i32, i32, i32) {
    %c0_i32 = arith.constant 0 : i32
    %c0_i32_0 = arith.constant 0 : i32
    %c0_i32_1 = arith.constant 0 : i32
    return %arg0, %c0_i32, %c0_i32_0 : i32, i32, i32
  }
}

module attributes {stable_mosaic.version = 11 : i64} {
  func.func @_norm_head_kernel(%arg0: i32, %arg1: memref<2x128xf32, #tpu.memory_space<vmem>>, %arg2: memref<1x128xf32, #tpu.memory_space<vmem>>, %arg3: memref<1x128xf32, #tpu.memory_space<vmem>>, %arg4: memref<128x128xbf16, #tpu.memory_space<vmem>>, %arg5: memref<1x128xf32, #tpu.memory_space<vmem>>, %arg6: memref<2x128xf32, #tpu.memory_space<vmem>>) attributes {dimension_semantics = [#tpu.dimension_semantics<arbitrary>], iteration_bounds = array<i64: 1>, scalar_prefetch = 0 : i64, scratch_operands = 0 : i64, tpu.core_type = #tpu.core_type<tc>, window_params = [{pipeline_mode = #tpu.pipeline_mode<synchronous>, transform_indices = @transform_0, window_bounds = array<i64: 2, 128>}, {pipeline_mode = #tpu.pipeline_mode<synchronous>, transform_indices = @transform_1, window_bounds = array<i64: 1, 128>}, {pipeline_mode = #tpu.pipeline_mode<synchronous>, transform_indices = @transform_2, window_bounds = array<i64: 1, 128>}, {pipeline_mode = #tpu.pipeline_mode<synchronous>, transform_indices = @transform_3, window_bounds = array<i64: 128, 128>}, {pipeline_mode = #tpu.pipeline_mode<synchronous>, transform_indices = @transform_4, window_bounds = array<i64: 1, 128>}, {pipeline_mode = #tpu.pipeline_mode<synchronous>, transform_indices = @transform_5, window_bounds = array<i64: 2, 128>}]} {
    %c0 = arith.constant 0 : index
    %c0_0 = arith.constant 0 : index
    %0 = vector.load %arg1[%c0, %c0_0] : memref<2x128xf32, #tpu.memory_space<vmem>>, vector<2x128xf32>
    %c0_1 = arith.constant 0 : index
    %c0_2 = arith.constant 0 : index
    %1 = vector.load %arg2[%c0_1, %c0_2] : memref<1x128xf32, #tpu.memory_space<vmem>>, vector<1x128xf32>
    %c0_3 = arith.constant 0 : index
    %c0_4 = arith.constant 0 : index
    %2 = vector.load %arg3[%c0_3, %c0_4] : memref<1x128xf32, #tpu.memory_space<vmem>>, vector<1x128xf32>
    %cst = arith.constant dense<0.000000e+00> : vector<2xf32>
    %3 = vector.multi_reduction <add>, %0, %cst [1] : vector<2x128xf32> to vector<2xf32>
    %4 = vector.shape_cast %3 : vector<2xf32> to vector<2x1xf32>
    %cst_5 = arith.constant 1.280000e+02 : f32
    %5 = vector.broadcast %cst_5 : f32 to vector<2x1xf32>
    %6 = arith.divf %4, %5 : vector<2x1xf32>
    %7 = vector.broadcast %6 : vector<2x1xf32> to vector<2x128xf32>
    %8 = arith.subf %0, %7 : vector<2x128xf32>
    %9 = arith.mulf %8, %8 : vector<2x128xf32>
    %cst_6 = arith.constant dense<0.000000e+00> : vector<2xf32>
    %10 = vector.multi_reduction <add>, %9, %cst_6 [1] : vector<2x128xf32> to vector<2xf32>
    %11 = vector.shape_cast %10 : vector<2xf32> to vector<2x1xf32>
    %cst_7 = arith.constant 1.280000e+02 : f32
    %12 = vector.broadcast %cst_7 : f32 to vector<2x1xf32>
    %13 = arith.divf %11, %12 : vector<2x1xf32>
    %14 = vector.broadcast %6 : vector<2x1xf32> to vector<2x128xf32>
    %15 = arith.subf %0, %14 : vector<2x128xf32>
    %cst_8 = arith.constant 9.99999974E-6 : f32
    %16 = vector.broadcast %cst_8 : f32 to vector<2x1xf32>
    %17 = arith.addf %13, %16 : vector<2x1xf32>
    %18 = math.rsqrt %17 : vector<2x1xf32>
    %19 = vector.broadcast %18 : vector<2x1xf32> to vector<2x128xf32>
    %20 = arith.mulf %15, %19 : vector<2x128xf32>
    %21 = vector.broadcast %1 : vector<1x128xf32> to vector<2x128xf32>
    %22 = arith.mulf %20, %21 : vector<2x128xf32>
    %23 = vector.broadcast %2 : vector<1x128xf32> to vector<2x128xf32>
    %24 = arith.addf %22, %23 : vector<2x128xf32>
    %25 = arith.truncf %24 : vector<2x128xf32> to vector<2x128xbf16>
    %c0_9 = arith.constant 0 : index
    %c0_10 = arith.constant 0 : index
    %26 = vector.load %arg4[%c0_9, %c0_10] : memref<128x128xbf16, #tpu.memory_space<vmem>>, vector<128x128xbf16>
    %cst_11 = arith.constant dense<0.000000e+00> : vector<2x128xf32>
    %27 = tpu.matmul %25, %26, %cst_11 {dimension_numbers = #tpu.dot_dimension_numbers<[1], [0], [0], [1], [0, 0, 1, 1], [], []>} : vector<2x128xbf16>, vector<128x128xbf16>, vector<2x128xf32> -> vector<2x128xf32>
    %c0_12 = arith.constant 0 : index
    %c0_13 = arith.constant 0 : index
    %28 = vector.load %arg5[%c0_12, %c0_13] : memref<1x128xf32, #tpu.memory_space<vmem>>, vector<1x128xf32>
    %29 = vector.broadcast %28 : vector<1x128xf32> to vector<2x128xf32>
    %30 = arith.addf %27, %29 : vector<2x128xf32>
    %c0_14 = arith.constant 0 : index
    %c0_15 = arith.constant 0 : index
    %31 = vector.load %arg6[%c0_14, %c0_15] : memref<2x128xf32, #tpu.memory_space<vmem>>, vector<2x128xf32>
    tpu.vector_store %arg6[%c0_14, %c0_15], %30 {strides = array<i32>} : memref<2x128xf32, #tpu.memory_space<vmem>>, vector<2x128xf32>,
    return
  }
  func.func @transform_0(%arg0: i32) -> (i32, i32) {
    %c0_i32 = arith.constant 0 : i32
    %c0_i32_0 = arith.constant 0 : i32
    %c0_i32_1 = arith.constant 0 : i32
    return %c0_i32, %c0_i32_0 : i32, i32
  }
  func.func @transform_1(%arg0: i32) -> (i32, i32) {
    %c0_i32 = arith.constant 0 : i32
    %c0_i32_0 = arith.constant 0 : i32
    %c0_i32_1 = arith.constant 0 : i32
    return %c0_i32, %c0_i32_0 : i32, i32
  }
  func.func @transform_2(%arg0: i32) -> (i32, i32) {
    %c0_i32 = arith.constant 0 : i32
    %c0_i32_0 = arith.constant 0 : i32
    %c0_i32_1 = arith.constant 0 : i32
    return %c0_i32, %c0_i32_0 : i32, i32
  }
  func.func @transform_3(%arg0: i32) -> (i32, i32) {
    %c0_i32 = arith.constant 0 : i32
    %c0_i32_0 = arith.constant 0 : i32
    %c0_i32_1 = arith.constant 0 : i32
    return %c0_i32, %c0_i32_0 : i32, i32
  }
  func.func @transform_4(%arg0: i32) -> (i32, i32) {
    %c0_i32 = arith.constant 0 : i32
    %c0_i32_0 = arith.constant 0 : i32
    %c0_i32_1 = arith.constant 0 : i32
    return %c0_i32, %c0_i32_0 : i32, i32
  }
  func.func @transform_5(%arg0: i32) -> (i32, i32) {
    %c0_i32 = arith.constant 0 : i32
    %c0_i32_0 = arith.constant 0 : i32
    %c0_i32_1 = arith.constant 0 : i32
    return %c0_i32, %c0_i32_0 : i32, i32
  }
}

module attributes {stable_mosaic.version = 11 : i64} {
  func.func @_backbone_kernel(%arg0: i32, %arg1: i32, %arg2: memref<1x8x128xf32, #tpu.memory_space<vmem>>, %arg3: memref<1x1x128xf32, #tpu.memory_space<vmem>>, %arg4: memref<1x1x128xf32, #tpu.memory_space<vmem>>, %arg5: memref<1x128x384xbf16, #tpu.memory_space<vmem>>, %arg6: memref<1x128x128xbf16, #tpu.memory_space<vmem>>, %arg7: memref<1x1x128xf32, #tpu.memory_space<vmem>>, %arg8: memref<1x1x128xf32, #tpu.memory_space<vmem>>, %arg9: memref<1x1x128xf32, #tpu.memory_space<vmem>>, %arg10: memref<1x128x512xbf16, #tpu.memory_space<vmem>>, %arg11: memref<1x1x512xf32, #tpu.memory_space<vmem>>, %arg12: memref<1x512x128xbf16, #tpu.memory_space<vmem>>, %arg13: memref<1x1x128xf32, #tpu.memory_space<vmem>>, %arg14: memref<1x8x128xf32, #tpu.memory_space<vmem>>, %arg15: memref<8x128xbf16, #tpu.memory_space<vmem>>) attributes {dimension_semantics = [#tpu.dimension_semantics<parallel>, #tpu.dimension_semantics<arbitrary>], iteration_bounds = array<i64: 2, 2>, scalar_prefetch = 0 : i64, scratch_operands = 1 : i64, tpu.core_type = #tpu.core_type<tc>, window_params = [{transform_indices = @transform_0, window_bounds = array<i64: 1, 8, 128>}, {transform_indices = @transform_1, window_bounds = array<i64: 1, 1, 128>}, {transform_indices = @transform_2, window_bounds = array<i64: 1, 1, 128>}, {transform_indices = @transform_3, window_bounds = array<i64: 1, 128, 384>}, {transform_indices = @transform_4, window_bounds = array<i64: 1, 128, 128>}, {transform_indices = @transform_5, window_bounds = array<i64: 1, 1, 128>}, {transform_indices = @transform_6, window_bounds = array<i64: 1, 1, 128>}, {transform_indices = @transform_7, window_bounds = array<i64: 1, 1, 128>}, {transform_indices = @transform_8, window_bounds = array<i64: 1, 128, 512>}, {transform_indices = @transform_9, window_bounds = array<i64: 1, 1, 512>}, {transform_indices = @transform_10, window_bounds = array<i64: 1, 512, 128>}, {transform_indices = @transform_11, window_bounds = array<i64: 1, 1, 128>}, {transform_indices = @transform_12, window_bounds = array<i64: 1, 8, 128>}]} {
    %c0_i32 = arith.constant 0 : i32
    %0 = arith.cmpi eq, %arg1, %c0_i32 : i32
    %1 = arith.extui %0 : i1 to i32
    %c0_i32_0 = arith.constant 0 : i32
    %2 = arith.cmpi ne, %1, %c0_i32_0 : i32
    scf.if %2 {
      %c0_65 = arith.constant 0 : index
      %c0_66 = arith.constant 0 : index
      %c0_67 = arith.constant 0 : index
      %129 = vector.load %arg2[%c0_65, %c0_66, %c0_67] : memref<1x8x128xf32, #tpu.memory_space<vmem>>, vector<1x8x128xf32>
      %130 = vector.shape_cast %129 : vector<1x8x128xf32> to vector<8x128xf32>
      %c0_68 = arith.constant 0 : index
      %c0_69 = arith.constant 0 : index
      %c0_70 = arith.constant 0 : index
      %131 = vector.load %arg14[%c0_68, %c0_69, %c0_70] : memref<1x8x128xf32, #tpu.memory_space<vmem>>, vector<1x8x128xf32>
      %132 = vector.shape_cast %131 : vector<1x8x128xf32> to vector<8x128xf32>
      %133 = vector.shape_cast %130 : vector<8x128xf32> to vector<1x8x128xf32>
      tpu.vector_store %arg14[%c0_68, %c0_69, %c0_70], %133 {strides = array<i32>} : memref<1x8x128xf32, #tpu.memory_space<vmem>>, vector<1x8x128xf32>,
    } else {
    }
    %c0 = arith.constant 0 : index
    %c0_1 = arith.constant 0 : index
    %c0_2 = arith.constant 0 : index
    %3 = vector.load %arg14[%c0, %c0_1, %c0_2] : memref<1x8x128xf32, #tpu.memory_space<vmem>>, vector<1x8x128xf32>
    %4 = vector.shape_cast %3 : vector<1x8x128xf32> to vector<8x128xf32>
    %c0_3 = arith.constant 0 : index
    %c0_4 = arith.constant 0 : index
    %c0_5 = arith.constant 0 : index
    %5 = vector.load %arg3[%c0_3, %c0_4, %c0_5] : memref<1x1x128xf32, #tpu.memory_space<vmem>>, vector<1x1x128xf32>
    %6 = vector.shape_cast %5 : vector<1x1x128xf32> to vector<1x128xf32>
    %c0_6 = arith.constant 0 : index
    %c0_7 = arith.constant 0 : index
    %c0_8 = arith.constant 0 : index
    %7 = vector.load %arg4[%c0_6, %c0_7, %c0_8] : memref<1x1x128xf32, #tpu.memory_space<vmem>>, vector<1x1x128xf32>
    %8 = vector.shape_cast %7 : vector<1x1x128xf32> to vector<1x128xf32>
    %cst = arith.constant dense<0.000000e+00> : vector<8xf32>
    %9 = vector.multi_reduction <add>, %4, %cst [1] : vector<8x128xf32> to vector<8xf32>
    %10 = vector.shape_cast %9 : vector<8xf32> to vector<8x1xf32>
    %cst_9 = arith.constant 1.280000e+02 : f32
    %11 = vector.broadcast %cst_9 : f32 to vector<8x1xf32>
    %12 = arith.divf %10, %11 : vector<8x1xf32>
    %13 = vector.broadcast %12 : vector<8x1xf32> to vector<8x128xf32>
    %14 = arith.subf %4, %13 : vector<8x128xf32>
    %15 = arith.mulf %14, %14 : vector<8x128xf32>
    %cst_10 = arith.constant dense<0.000000e+00> : vector<8xf32>
    %16 = vector.multi_reduction <add>, %15, %cst_10 [1] : vector<8x128xf32> to vector<8xf32>
    %17 = vector.shape_cast %16 : vector<8xf32> to vector<8x1xf32>
    %cst_11 = arith.constant 1.280000e+02 : f32
    %18 = vector.broadcast %cst_11 : f32 to vector<8x1xf32>
    %19 = arith.divf %17, %18 : vector<8x1xf32>
    %20 = vector.broadcast %12 : vector<8x1xf32> to vector<8x128xf32>
    %21 = arith.subf %4, %20 : vector<8x128xf32>
    %cst_12 = arith.constant 9.99999974E-6 : f32
    %22 = vector.broadcast %cst_12 : f32 to vector<8x1xf32>
    %23 = arith.addf %19, %22 : vector<8x1xf32>
    %24 = math.rsqrt %23 : vector<8x1xf32>
    %25 = vector.broadcast %24 : vector<8x1xf32> to vector<8x128xf32>
    %26 = arith.mulf %21, %25 : vector<8x128xf32>
    %27 = vector.broadcast %6 : vector<1x128xf32> to vector<8x128xf32>
    %28 = arith.mulf %26, %27 : vector<8x128xf32>
    %29 = vector.broadcast %8 : vector<1x128xf32> to vector<8x128xf32>
    %30 = arith.addf %28, %29 : vector<8x128xf32>
    %31 = arith.truncf %30 : vector<8x128xf32> to vector<8x128xbf16>
    %c0_13 = arith.constant 0 : index
    %c0_14 = arith.constant 0 : index
    %c0_15 = arith.constant 0 : index
    %32 = vector.load %arg5[%c0_13, %c0_14, %c0_15] : memref<1x128x384xbf16, #tpu.memory_space<vmem>>, vector<1x128x384xbf16>
    %33 = vector.shape_cast %32 : vector<1x128x384xbf16> to vector<128x384xbf16>
    %cst_16 = arith.constant dense<0.000000e+00> : vector<8x384xf32>
    %34 = tpu.matmul %31, %33, %cst_16 {dimension_numbers = #tpu.dot_dimension_numbers<[1], [0], [0], [1], [0, 0, 1, 1], [], []>} : vector<8x128xbf16>, vector<128x384xbf16>, vector<8x384xf32> -> vector<8x384xf32>
    %35 = tpu.iota {dimensions = array<i32: 1>} : vector<8x8xi32>
    %c5_i32 = arith.constant 5 : i32
    %36 = vector.broadcast %c5_i32 : i32 to vector<8x8xi32>
    %37 = arith.cmpi slt, %35, %36 : vector<8x8xi32>
    %38 = vector.extract_strided_slice %34 {offsets = [0, 0], sizes = [8, 128], strides = [1, 1]} : vector<8x384xf32> to vector<8x128xf32>
    %39 = arith.truncf %38 : vector<8x128xf32> to vector<8x128xbf16>
    %40 = vector.extract_strided_slice %34 {offsets = [0, 128], sizes = [8, 128], strides = [1, 1]} : vector<8x384xf32> to vector<8x128xf32>
    %41 = arith.truncf %40 : vector<8x128xf32> to vector<8x128xbf16>
    %42 = vector.extract_strided_slice %34 {offsets = [0, 256], sizes = [8, 128], strides = [1, 1]} : vector<8x384xf32> to vector<8x128xf32>
    %43 = arith.truncf %42 : vector<8x128xf32> to vector<8x128xbf16>
    %cst_17 = arith.constant dense<0.000000e+00> : vector<8x8xf32>
    %44 = tpu.matmul %39, %41, %cst_17 {dimension_numbers = #tpu.dot_dimension_numbers<[1], [1], [0], [0], [0, 0, 1, 0], [], []>} : vector<8x128xbf16>, vector<8x128xbf16>, vector<8x8xf32> -> vector<8x8xf32>
    %cst_18 = arith.constant -1.000000e+30 : f32
    %45 = vector.broadcast %cst_18 : f32 to vector<8x8xf32>
    %46 = arith.select %37, %44, %45 : vector<8x8xi1>, vector<8x8xf32>
    %cst_19 = arith.constant dense<0xFF800000> : vector<8xf32>
    %47 = vector.multi_reduction <maximumf>, %46, %cst_19 [1] : vector<8x8xf32> to vector<8xf32>
    %48 = vector.shape_cast %47 : vector<8xf32> to vector<8x1xf32>
    %49 = vector.broadcast %48 : vector<8x1xf32> to vector<8x8xf32>
    %50 = arith.subf %46, %49 : vector<8x8xf32>
    %51 = math.exp %50 : vector<8x8xf32>
    %cst_20 = arith.constant dense<0.000000e+00> : vector<8xf32>
    %52 = vector.multi_reduction <add>, %51, %cst_20 [1] : vector<8x8xf32> to vector<8xf32>
    %53 = vector.shape_cast %52 : vector<8xf32> to vector<8x1xf32>
    %54 = tpu.reciprocal %53 {approx = true} : vector<8x1xf32> -> vector<8x1xf32>
    %55 = vector.broadcast %54 : vector<8x1xf32> to vector<8x8xf32>
    %56 = arith.mulf %51, %55 : vector<8x8xf32>
    %57 = arith.truncf %56 : vector<8x8xf32> to vector<8x8xbf16>
    %cst_21 = arith.constant dense<0.000000e+00> : vector<8x128xf32>
    %58 = tpu.matmul %57, %43, %cst_21 {dimension_numbers = #tpu.dot_dimension_numbers<[1], [0], [0], [1], [0, 0, 1, 1], [], []>} : vector<8x8xbf16>, vector<8x128xbf16>, vector<8x128xf32> -> vector<8x128xf32>
    %59 = arith.truncf %58 : vector<8x128xf32> to vector<8x128xbf16>
    %c0_22 = arith.constant 0 : index
    %c0_23 = arith.constant 0 : index
    %60 = vector.load %arg15[%c0_22, %c0_23] : memref<8x128xbf16, #tpu.memory_space<vmem>>, vector<8x128xbf16>
    tpu.vector_store %arg15[%c0_22, %c0_23], %59 {strides = array<i32>} : memref<8x128xbf16, #tpu.memory_space<vmem>>, vector<8x128xbf16>,
    %c0_24 = arith.constant 0 : index
    %c0_25 = arith.constant 0 : index
    %61 = vector.load %arg15[%c0_24, %c0_25] : memref<8x128xbf16, #tpu.memory_space<vmem>>, vector<8x128xbf16>
    %c0_26 = arith.constant 0 : index
    %c0_27 = arith.constant 0 : index
    %c0_28 = arith.constant 0 : index
    %62 = vector.load %arg6[%c0_26, %c0_27, %c0_28] : memref<1x128x128xbf16, #tpu.memory_space<vmem>>, vector<1x128x128xbf16>
    %63 = vector.shape_cast %62 : vector<1x128x128xbf16> to vector<128x128xbf16>
    %cst_29 = arith.constant dense<0.000000e+00> : vector<8x128xf32>
    %64 = tpu.matmul %61, %63, %cst_29 {dimension_numbers = #tpu.dot_dimension_numbers<[1], [0], [0], [1], [0, 0, 1, 1], [], []>} : vector<8x128xbf16>, vector<128x128xbf16>, vector<8x128xf32> -> vector<8x128xf32>
    %c0_30 = arith.constant 0 : index
    %c0_31 = arith.constant 0 : index
    %c0_32 = arith.constant 0 : index
    %65 = vector.load %arg7[%c0_30, %c0_31, %c0_32] : memref<1x1x128xf32, #tpu.memory_space<vmem>>, vector<1x1x128xf32>
    %66 = vector.shape_cast %65 : vector<1x1x128xf32> to vector<1x128xf32>
    %67 = vector.broadcast %66 : vector<1x128xf32> to vector<8x128xf32>
    %68 = arith.addf %64, %67 : vector<8x128xf32>
    %69 = arith.addf %4, %68 : vector<8x128xf32>
    %c0_33 = arith.constant 0 : index
    %c0_34 = arith.constant 0 : index
    %c0_35 = arith.constant 0 : index
    %70 = vector.load %arg8[%c0_33, %c0_34, %c0_35] : memref<1x1x128xf32, #tpu.memory_space<vmem>>, vector<1x1x128xf32>
    %71 = vector.shape_cast %70 : vector<1x1x128xf32> to vector<1x128xf32>
    %c0_36 = arith.constant 0 : index
    %c0_37 = arith.constant 0 : index
    %c0_38 = arith.constant 0 : index
    %72 = vector.load %arg9[%c0_36, %c0_37, %c0_38] : memref<1x1x128xf32, #tpu.memory_space<vmem>>, vector<1x1x128xf32>
    %73 = vector.shape_cast %72 : vector<1x1x128xf32> to vector<1x128xf32>
    %cst_39 = arith.constant dense<0.000000e+00> : vector<8xf32>
    %74 = vector.multi_reduction <add>, %69, %cst_39 [1] : vector<8x128xf32> to vector<8xf32>
    %75 = vector.shape_cast %74 : vector<8xf32> to vector<8x1xf32>
    %cst_40 = arith.constant 1.280000e+02 : f32
    %76 = vector.broadcast %cst_40 : f32 to vector<8x1xf32>
    %77 = arith.divf %75, %76 : vector<8x1xf32>
    %78 = vector.broadcast %77 : vector<8x1xf32> to vector<8x128xf32>
    %79 = arith.subf %69, %78 : vector<8x128xf32>
    %80 = arith.mulf %79, %79 : vector<8x128xf32>
    %cst_41 = arith.constant dense<0.000000e+00> : vector<8xf32>
    %81 = vector.multi_reduction <add>, %80, %cst_41 [1] : vector<8x128xf32> to vector<8xf32>
    %82 = vector.shape_cast %81 : vector<8xf32> to vector<8x1xf32>
    %cst_42 = arith.constant 1.280000e+02 : f32
    %83 = vector.broadcast %cst_42 : f32 to vector<8x1xf32>
    %84 = arith.divf %82, %83 : vector<8x1xf32>
    %85 = vector.broadcast %77 : vector<8x1xf32> to vector<8x128xf32>
    %86 = arith.subf %69, %85 : vector<8x128xf32>
    %cst_43 = arith.constant 9.99999974E-6 : f32
    %87 = vector.broadcast %cst_43 : f32 to vector<8x1xf32>
    %88 = arith.addf %84, %87 : vector<8x1xf32>
    %89 = math.rsqrt %88 : vector<8x1xf32>
    %90 = vector.broadcast %89 : vector<8x1xf32> to vector<8x128xf32>
    %91 = arith.mulf %86, %90 : vector<8x128xf32>
    %92 = vector.broadcast %71 : vector<1x128xf32> to vector<8x128xf32>
    %93 = arith.mulf %91, %92 : vector<8x128xf32>
    %94 = vector.broadcast %73 : vector<1x128xf32> to vector<8x128xf32>
    %95 = arith.addf %93, %94 : vector<8x128xf32>
    %96 = arith.truncf %95 : vector<8x128xf32> to vector<8x128xbf16>
    %c0_44 = arith.constant 0 : index
    %c0_45 = arith.constant 0 : index
    %c0_46 = arith.constant 0 : index
    %97 = vector.load %arg10[%c0_44, %c0_45, %c0_46] : memref<1x128x512xbf16, #tpu.memory_space<vmem>>, vector<1x128x512xbf16>
    %98 = vector.shape_cast %97 : vector<1x128x512xbf16> to vector<128x512xbf16>
    %cst_47 = arith.constant dense<0.000000e+00> : vector<8x512xf32>
    %99 = tpu.matmul %96, %98, %cst_47 {dimension_numbers = #tpu.dot_dimension_numbers<[1], [0], [0], [1], [0, 0, 1, 1], [], []>} : vector<8x128xbf16>, vector<128x512xbf16>, vector<8x512xf32> -> vector<8x512xf32>
    %c0_48 = arith.constant 0 : index
    %c0_49 = arith.constant 0 : index
    %c0_50 = arith.constant 0 : index
    %100 = vector.load %arg11[%c0_48, %c0_49, %c0_50] : memref<1x1x512xf32, #tpu.memory_space<vmem>>, vector<1x1x512xf32>
    %101 = vector.shape_cast %100 : vector<1x1x512xf32> to vector<1x512xf32>
    %102 = vector.broadcast %101 : vector<1x512xf32> to vector<8x512xf32>
    %103 = arith.addf %99, %102 : vector<8x512xf32>
    %cst_51 = arith.constant 5.000000e-01 : f32
    %104 = vector.broadcast %cst_51 : f32 to vector<8x512xf32>
    %105 = arith.mulf %104, %103 : vector<8x512xf32>
    %cst_52 = arith.constant 4.471500e-02 : f32
    %106 = vector.broadcast %cst_52 : f32 to vector<8x512xf32>
    %107 = arith.mulf %106, %103 : vector<8x512xf32>
    %108 = arith.mulf %107, %103 : vector<8x512xf32>
    %109 = arith.mulf %108, %103 : vector<8x512xf32>
    %110 = arith.addf %103, %109 : vector<8x512xf32>
    %cst_53 = arith.constant 0.797884583 : f32
    %111 = vector.broadcast %cst_53 : f32 to vector<8x512xf32>
    %112 = arith.mulf %111, %110 : vector<8x512xf32>
    %113 = math.tanh %112 : vector<8x512xf32>
    %cst_54 = arith.constant 1.000000e+00 : f32
    %114 = vector.broadcast %cst_54 : f32 to vector<8x512xf32>
    %115 = arith.addf %114, %113 : vector<8x512xf32>
    %116 = arith.mulf %105, %115 : vector<8x512xf32>
    %117 = arith.truncf %116 : vector<8x512xf32> to vector<8x512xbf16>
    %c0_55 = arith.constant 0 : index
    %c0_56 = arith.constant 0 : index
    %c0_57 = arith.constant 0 : index
    %118 = vector.load %arg12[%c0_55, %c0_56, %c0_57] : memref<1x512x128xbf16, #tpu.memory_space<vmem>>, vector<1x512x128xbf16>
    %119 = vector.shape_cast %118 : vector<1x512x128xbf16> to vector<512x128xbf16>
    %cst_58 = arith.constant dense<0.000000e+00> : vector<8x128xf32>
    %120 = tpu.matmul %117, %119, %cst_58 {dimension_numbers = #tpu.dot_dimension_numbers<[1], [0], [0], [1], [0, 0, 1, 1], [], []>} : vector<8x512xbf16>, vector<512x128xbf16>, vector<8x128xf32> -> vector<8x128xf32>
    %c0_59 = arith.constant 0 : index
    %c0_60 = arith.constant 0 : index
    %c0_61 = arith.constant 0 : index
    %121 = vector.load %arg13[%c0_59, %c0_60, %c0_61] : memref<1x1x128xf32, #tpu.memory_space<vmem>>, vector<1x1x128xf32>
    %122 = vector.shape_cast %121 : vector<1x1x128xf32> to vector<1x128xf32>
    %123 = vector.broadcast %122 : vector<1x128xf32> to vector<8x128xf32>
    %124 = arith.addf %120, %123 : vector<8x128xf32>
    %125 = arith.addf %69, %124 : vector<8x128xf32>
    %c0_62 = arith.constant 0 : index
    %c0_63 = arith.constant 0 : index
    %c0_64 = arith.constant 0 : index
    %126 = vector.load %arg14[%c0_62, %c0_63, %c0_64] : memref<1x8x128xf32, #tpu.memory_space<vmem>>, vector<1x8x128xf32>
    %127 = vector.shape_cast %126 : vector<1x8x128xf32> to vector<8x128xf32>
    %128 = vector.shape_cast %125 : vector<8x128xf32> to vector<1x8x128xf32>
    tpu.vector_store %arg14[%c0_62, %c0_63, %c0_64], %128 {strides = array<i32>} : memref<1x8x128xf32, #tpu.memory_space<vmem>>, vector<1x8x128xf32>,
    return
  }
  func.func @transform_0(%arg0: i32, %arg1: i32) -> (i32, i32, i32) {
    %c0_i32 = arith.constant 0 : i32
    %c0_i32_0 = arith.constant 0 : i32
    %c0_i32_1 = arith.constant 0 : i32
    return %arg0, %c0_i32, %c0_i32_0 : i32, i32, i32
  }
  func.func @transform_1(%arg0: i32, %arg1: i32) -> (i32, i32, i32) {
    %c0_i32 = arith.constant 0 : i32
    %c0_i32_0 = arith.constant 0 : i32
    %c0_i32_1 = arith.constant 0 : i32
    return %arg1, %c0_i32, %c0_i32_0 : i32, i32, i32
  }
  func.func @transform_2(%arg0: i32, %arg1: i32) -> (i32, i32, i32) {
    %c0_i32 = arith.constant 0 : i32
    %c0_i32_0 = arith.constant 0 : i32
    %c0_i32_1 = arith.constant 0 : i32
    return %arg1, %c0_i32, %c0_i32_0 : i32, i32, i32
  }
  func.func @transform_3(%arg0: i32, %arg1: i32) -> (i32, i32, i32) {
    %c0_i32 = arith.constant 0 : i32
    %c0_i32_0 = arith.constant 0 : i32
    %c0_i32_1 = arith.constant 0 : i32
    return %arg1, %c0_i32, %c0_i32_0 : i32, i32, i32
  }
  func.func @transform_4(%arg0: i32, %arg1: i32) -> (i32, i32, i32) {
    %c0_i32 = arith.constant 0 : i32
    %c0_i32_0 = arith.constant 0 : i32
    %c0_i32_1 = arith.constant 0 : i32
    return %arg1, %c0_i32, %c0_i32_0 : i32, i32, i32
  }
  func.func @transform_5(%arg0: i32, %arg1: i32) -> (i32, i32, i32) {
    %c0_i32 = arith.constant 0 : i32
    %c0_i32_0 = arith.constant 0 : i32
    %c0_i32_1 = arith.constant 0 : i32
    return %arg1, %c0_i32, %c0_i32_0 : i32, i32, i32
  }
  func.func @transform_6(%arg0: i32, %arg1: i32) -> (i32, i32, i32) {
    %c0_i32 = arith.constant 0 : i32
    %c0_i32_0 = arith.constant 0 : i32
    %c0_i32_1 = arith.constant 0 : i32
    return %arg1, %c0_i32, %c0_i32_0 : i32, i32, i32
  }
  func.func @transform_7(%arg0: i32, %arg1: i32) -> (i32, i32, i32) {
    %c0_i32 = arith.constant 0 : i32
    %c0_i32_0 = arith.constant 0 : i32
    %c0_i32_1 = arith.constant 0 : i32
    return %arg1, %c0_i32, %c0_i32_0 : i32, i32, i32
  }
  func.func @transform_8(%arg0: i32, %arg1: i32) -> (i32, i32, i32) {
    %c0_i32 = arith.constant 0 : i32
    %c0_i32_0 = arith.constant 0 : i32
    %c0_i32_1 = arith.constant 0 : i32
    return %arg1, %c0_i32, %c0_i32_0 : i32, i32, i32
  }
  func.func @transform_9(%arg0: i32, %arg1: i32) -> (i32, i32, i32) {
    %c0_i32 = arith.constant 0 : i32
    %c0_i32_0 = arith.constant 0 : i32
    %c0_i32_1 = arith.constant 0 : i32
    return %arg1, %c0_i32, %c0_i32_0 : i32, i32, i32
  }
  func.func @transform_10(%arg0: i32, %arg1: i32) -> (i32, i32, i32) {
    %c0_i32 = arith.constant 0 : i32
    %c0_i32_0 = arith.constant 0 : i32
    %c0_i32_1 = arith.constant 0 : i32
    return %arg1, %c0_i32, %c0_i32_0 : i32, i32, i32
  }
  func.func @transform_11(%arg0: i32, %arg1: i32) -> (i32, i32, i32) {
    %c0_i32 = arith.constant 0 : i32
    %c0_i32_0 = arith.constant 0 : i32
    %c0_i32_1 = arith.constant 0 : i32
    return %arg1, %c0_i32, %c0_i32_0 : i32, i32, i32
  }
  func.func @transform_12(%arg0: i32, %arg1: i32) -> (i32, i32, i32) {
    %c0_i32 = arith.constant 0 : i32
    %c0_i32_0 = arith.constant 0 : i32
    %c0_i32_1 = arith.constant 0 : i32
    return %arg0, %c0_i32, %c0_i32_0 : i32, i32, i32
  }
}

</mosaic_0001>

<bundles_post_ra>
// kernel: vit_forward.3
= control target key start
LH: loop header
LB: loop body
LE: loop exit
PB: predicated region body
PF: predicated region fallthrough
CT: control target
= control target key end

     0   :  { %9 = vsyncpa [#allocation3], 0  ;;  %s842_s0 = inlined_call_operand.vmem [shape: bf16[2,8,256], index: 0, kind: input, shape index: {}]   ;;  %s843_s1 = inlined_call_operand.vmem [shape: bf16[256,128], index: 1, kind: input, shape index: {}]   ;;  %s844_s2 = inlined_call_operand.hbm [shape: f32[1,128], index: 2, kind: input, shape index: {}]   ;;  %s845_s3 = inlined_call_operand.hbm [shape: f32[8,128], index: 3, kind: input, shape index: {}]   ;;  %s846_s4 = inlined_call_operand.vmem [shape: f32[2,8,128], index: 4, kind: output, shape index: {}]  }
   0x1   :  { %10 = vsyncpa [#allocation5], 0  ;;  %s694_s15 = smov 0  }
   0x2 LB: > { %s700_s16 = sadd.s32 4294967295, %s665_s15   ;;  %p494_p0 = scmp.ge.s32.totalorder %s665_s15, 1  ;;  %s665_s15 = sphi %s694_s15, %s16_s15  }
   0x3   : > { %p136_p1 = scmp.lt.s32.totalorder %s665_s15, 3  ;;  %p847_p2 = scmp.eq.s32.totalorder %s700_s16, 0 }
   0x4   : > { %s667_s18 = smov [#allocation2]   ;;  %s668_s20 = smov [#allocation4]  }
   0x5   : > { %p705_p3 = pnand %p494_p0, %p136_p1  ;;  %s152_s19 = sshll.u32 %s667_s18, 4  ;;  %s153_s19 = int_to_ptr.vmem [resolvable:$true] %s152_s19 }
   0x6   : > { %s163_s21 = sshll.u32 %s668_s20, 4  ;;  %s595_s25 = scalar_lea.hbm %s844_s2, 16  ;;  %s717_s21 = int_to_ptr.vmem [resolvable:$true] %s163_s21 }
   0x7   : > { %s849_s17 = scalar_select %p705_p3, 1, 0 }
   0x8   : > { %p556_p4 = pneg %p705_p3  ;;  %p596_p6 = scmp.ne.s32.totalorder %s844_s2, %s595_s25 }
   0x9   : > { %p602_p10 = scmp.lt.u32.totalorder %s595_s25, %s844_s2 }
   0xa   : > { %p713_p5 = pnand %p847_p2, %p556_p4 }
   0xc   : > { %p597_p7 = pneg %p713_p5 }
   0xe   : > { %p598_p8 = pnand %p597_p7, %p596_p6 }
  0x10   : > { %p599_p9 = pneg %p598_p8 }
  0x12   : > { %p604_p11 = pnand %p602_p10, %p599_p9 }
  0x14   : > { %607 = shalt.err (!%p604_p11)
}
  0x15   : > { %s608_s30 = scalar_lea.vmem %s153_s19, 16  ;;  %s615_s5 = scalar_lea.vmem %s153_s19, 32 }
  0x16   : > { %p609_p12 = scmp.ne.s32.totalorder %s153_s19, %s608_s30  ;;  %p616_p1 = scmp.lt.s32.totalorder %s153_s19, %s153_s19 }
  0x17   : > { %p617_p4 = scmp.lt.s32.totalorder %s615_s5, %s608_s30 }
  0x18   : > { %p611_p13 = pnand %p609_p12, %p597_p7 }
  0x19   : > { %p618_p2 = por %p617_p4, %p616_p1 }
  0x1a   : > { %p612_p0 = pneg %p611_p13 }
  0x1c   : > { %p619_p3 = pnand %p618_p2, %p612_p0 }
  0x1e   : > { %622 = shalt.err (!%p619_p3)
}
  0x1f   : > { %559 = dma.hbm_to_vmem [thread:$0]  (!%p713_p5), %s844_s2, 16, %s153_s19, [#allocation3]  }
  0x20   : > { %s623_s10 = scalar_lea.hbm %s845_s3, 128 }
  0x21   : > { %p624_p6 = scmp.ne.s32.totalorder %s845_s3, %s623_s10  ;;  %p630_p3 = scmp.lt.u32.totalorder %s623_s10, %s845_s3 }
  0x23   : > { %p626_p8 = pnand %p624_p6, %p597_p7 }
  0x25   : > { %p627_p2 = pneg %p626_p8 }
  0x27   : > { %p632_p9 = pnand %p630_p3, %p627_p2 }
  0x29   : > { %635 = shalt.err (!%p632_p9)
}
  0x2a   : > { %s636_s18 = scalar_lea.vmem %s717_s21, 128  ;;  %p644_p13 = scmp.lt.s32.totalorder %s717_s21, %s717_s21 }
  0x2b   : > { %p637_p10 = scmp.ne.s32.totalorder %s717_s21, %s636_s18  ;;  %p645_p0 = scmp.lt.s32.totalorder %s636_s18, %s636_s18 }
  0x2d   : > { %p639_p11 = pnand %p637_p10, %p597_p7  ;;  %p646_p1 = por %p645_p0, %p644_p13 }
  0x2f   : > { %p640_p12 = pneg %p639_p11 }
  0x31   : > { %p647_p4 = pnand %p646_p1, %p640_p12 }
  0x33   : > { %650 = shalt.err (!%p647_p4)
}
  0x34   : > { %562 = dma.hbm_to_vmem [thread:$0]  (!%p713_p5), %s845_s3, 128, %s717_s21, [#allocation5]  }
  0x35   : > { %p851_p6 = scmp.ne.s32.totalorder %s849_s17, 0 }
  0x36   : > { %p852_p8 = scmp.eq.s32.totalorder (!%p851_p6), %s700_s16, 0 }
  0x37   : > { %184 = sbr.rel (%p851_p6) target bundleno = 321 (0x141), region = 36 }
  0x3e   : > { %656 = dma.done.wait (%p852_p8), [#allocation3], 16   ;;  %p853_p7 = pmov %p852_p8 }
  0x40   : > { %658 = vsyncadd (%p853_p7), [#allocation3], 4294967280  ;;  %p854_p2 = pmov %p853_p7 }
  0x42   : > { %660 = dma.done.wait (%p854_p2), [#allocation5], 128   ;;  %p855_p3 = pmov %p854_p2 }
  0x43   : > { %v577_v0 = vld [vmem:[%s843_s1 + $0x40] sm:$0xff]   ;;  %v579_v2 = vld [vmem:[%s843_s1 + $0x48] sm:$0xff]   ;;  %p213_p5 = scmp.lt.s32.totalorder %s700_s16, 1  ;;  %v581_v4 = vld [vmem:[%s843_s1 + $0x50] sm:$0xff]   ;;  %v256_v19 = vlaneseq }
  0x44   : > { %662 = vsyncadd (%p855_p3), [#allocation5], 4294967168  ;;  %v578_v1 = vld [vmem:[%s843_s1] sm:$0xff]   ;;  %526 = vmatprep.subr.bf16.mxu0 %v577_v0  ;;  %v580_v3 = vld [vmem:[%s843_s1 + $0x8] sm:$0xff]  }
  0x45   : > { %527 = vmatpush3.bf16.msra.mxu0 %v578_v1  ;;  %s857_s16 = smov (!%p213_p5, %s700_s16), 1  ;;  %v582_v5 = vld [vmem:[%s843_s1 + $0x10] sm:$0xff]   ;;  %v583_v6 = vld [vmem:[%s843_s1 + $0x58] sm:$0xff]   ;;  %v585_v8 = vld [vmem:[%s843_s1 + $0x60] sm:$0xff]   ;;  %v257_v20 = vshrl.u32 %v256_v19, 7 }
  0x46   : > { %528 = vmatprep.subr.bf16.mxu0 %v579_v2  ;;  %s525_s8 = sshll.u32 %s857_s16, 3  ;;  %v584_v7 = vld [vmem:[%s843_s1 + $0x18] sm:$0xff]   ;;  %v586_v9 = vld [vmem:[%s843_s1 + $0x20] sm:$0xff]   ;;  %v587_v10 = vld [vmem:[%s843_s1 + $0x68] sm:$0xff]  }
  0x47   : > { %s217_s18 = scalar_lea.vmem %s842_s0, %s525_s8  ;;  %v588_v13 = vld [vmem:[%s843_s1 + $0x28] sm:$0xff]   ;;  %v589_v14 = vld [vmem:[%s843_s1 + $0x70] sm:$0xff]   ;;  %v591_v16 = vld [vmem:[%s843_s1 + $0x78] sm:$0xff]   ;;  %vm258_vm0 = vcmp.ge.s32.totalorder %v257_v20, 1  ;;  %vm259_vm1 = vcmp.lt.s32.totalorder %v257_v20, 5  ;;  %s221_s9 = scalar_lea.vmem %s846_s4, %s525_s8 }
  0x48   : > { %v223_v11 = vld [vmem:[%s217_s18] sm:$0xff]  ;;  %v590_v15 = vld [vmem:[%s843_s1 + $0x30] sm:$0xff]   ;;  %v592_v17 = vld [vmem:[%s843_s1 + $0x38] sm:$0xff]  }
  0x49   : > { %529 = vmatpush3.bf16.msra.mxu0 %v580_v3  ;;  %v506_v12 = vcombine.high %v223_v11, %v223_v11  ;;  %v505_v18 = vcombine.low %v223_v11, %v223_v11  ;;  %v504_v22 = vld [vmem:[#allocation2] ss:$0 sm:$0xff]  ;;  %vm260_vm2 = vmand %vm258_vm0, %vm259_vm1  ;;  %v261_v27 = vld [vmem:[#allocation4] sm:$0xff] }
  0x4a   : > { %530 = vmatprep.subr.bf16.mxu0 %v581_v4 }
  0x4b   : > { %404 = vmatprep.mubr.bf16.mxu0 %v506_v12 }
  0x4d   : > { %531 = vmatpush3.bf16.msra.mxu0 %v582_v5 }
  0x4e   : > { %532 = vmatprep.subr.bf16.mxu0 %v583_v6 }
  0x51   : > { %533 = vmatpush3.bf16.msra.mxu0 %v584_v7 }
  0x52   : > { %534 = vmatprep.subr.bf16.mxu0 %v585_v8 }
  0x55   : > { %535 = vmatpush3.bf16.msra.mxu0 %v586_v9 }
  0x56   : > { %536 = vmatprep.subr.bf16.mxu0 %v587_v10 }
  0x59   : > { %537 = vmatpush3.bf16.msra.mxu0 %v588_v13 }
  0x5a   : > { %538 = vmatprep.subr.bf16.mxu0 %v589_v14 }
  0x5d   : > { %539 = vmatpush3.bf16.msra.mxu0 %v590_v15 }
  0x5e   : > { %540 = vmatprep.subr.bf16.mxu0 %v591_v16 }
  0x61   : > { %541 = vmatpush3.bf16.msra.mxu0 %v592_v17 }
  0x64   : > { %405 = vmatmul.mubr.bf16.vlgmr.msra.gmra.mrb[0].mxu0 %v505_v18 }
 0x137   : > { %v542_v21 = vpop.f32.mrb[0].mxu0 }
 0x138   : > { %v543_v23 = vpop.f32.mrb[1].mxu0 }
 0x139   : > { %v544_v24 = vadd.f32 %v543_v23, %v542_v21  ;;  %v545_v25 = vpop.f32.mrb[2].mxu0 }
 0x13a   : > { %v546_v26 = vpop.f32.mrb[3].mxu0 }
 0x13b   : > { %v407_v28 = vadd.f32 %v544_v24, %v504_v22 }
 0x13d   : > { %v414_v29 = vsel %vm260_vm2, %v407_v28, 0.0 }
 0x13e   : > { %v415_v30 = vadd.f32 %v414_v29, %v261_v27 }
 0x140   : > { %416 = vst [vmem:[%s221_s9] sm:$0xff] %v415_v30 }
 0x141 PF: > { %s16_s15 = sadd.s32 1, %s665_s15  }
 0x142   : > { %p13_p9 = scmp.ge.s32.totalorder %s16_s15, 4  }
 0x144   :  { %15 = sbr.rel (!%p13_p9) target bundleno = 2 (0x2), region = 75 }
 0x14b   :  { %436 = vsyncpa [#allocation3], 1 }
 0x14c   :  { %438 = vsyncpa [#allocation3 + $0x1], 1 }
 0x14d   :  { %439 = vsyncpa [#allocation5], 1 }

// kernel: vit_forward.5
= control target key start
LH: loop header
LB: loop body
LE: loop exit
PB: predicated region body
PF: predicated region fallthrough
CT: control target
= control target key end

     0   :  { %vm24_vm0 = vcmask 1041408   ;;  %v222_v2 = vmov 0.0   ;;  %vm223_vm1 = vmmov 0   ;;  %s295_s0 = inlined_call_operand.vmem [shape: f32[2,128], index: 0, kind: input, shape index: {}]   ;;  %s296_s3 = inlined_call_operand.vmem [shape: bf16[128,128], index: 3, kind: input, shape index: {}]   ;;  %s297_s1 = inlined_call_operand.vmem [shape: f32[1,128], index: 1, kind: input, shape index: {}]   ;;  %s298_s2 = inlined_call_operand.vmem [shape: f32[1,128], index: 2, kind: input, shape index: {}]   ;;  %s299_s4 = inlined_call_operand.vmem [shape: f32[1,128], index: 4, kind: input, shape index: {}]   ;;  %s300_s5 = inlined_call_operand.vmem [shape: f32[2,128], index: 5, kind: output, shape index: {}]  }
   0x1   :  { %v21_v0 = vld [vmem:[%s295_s0] sm:$0x3]  ;;  %190 = vmatprep.subr.bf16.mxu0 %v222_v2  ;;  %v213_v4 = vld [vmem:[%s296_s3 + $0x8] sm:$0xff]   ;;  %v214_v10 = vld [vmem:[%s296_s3 + $0x10] sm:$0xff]   ;;  %206 = vmatprep.mubr.msk.bf16.mxu0 %vm223_vm1, %v222_v2 }
   0x2   :  { %v25_v1 = vsel %vm24_vm0, %v21_v0, 0.0  ;;  %v212_v3 = vld [vmem:[%s296_s3] sm:$0xff]   ;;  %v215_v11 = vld [vmem:[%s296_s3 + $0x18] sm:$0xff]   ;;  %v217_v13 = vld [vmem:[%s296_s3 + $0x28] sm:$0xff]  }
   0x3   :  { %26 = vadd.xlane.f32.xlu0 %v25_v1  ;;  %191 = vmatpush3.bf16.msra.mxu0 %v212_v3  ;;  %v216_v12 = vld [vmem:[%s296_s3 + $0x20] sm:$0xff]   ;;  %v218_v14 = vld [vmem:[%s296_s3 + $0x30] sm:$0xff]   ;;  %v219_v15 = vld [vmem:[%s296_s3 + $0x38] sm:$0xff]  }
   0x4   :  { %192 = vmatprep.subr.bf16.mxu0 %v222_v2  ;;  %v170_v20 = vld [vmem:[%s297_s1] ss:$0 sm:$0xff] }
   0x5   :  { %v171_v22 = vld [vmem:[%s298_s2] ss:$0 sm:$0xff] }
   0x6   :  { %v172_v26 = vld [vmem:[%s299_s4] ss:$0 sm:$0xff] }
   0x7   :  { %193 = vmatpush3.bf16.msra.mxu0 %v213_v4 }
   0x8   :  { %194 = vmatprep.subr.bf16.mxu0 %v222_v2 }
   0xb   :  { %195 = vmatpush3.bf16.msra.mxu0 %v214_v10 }
   0xc   :  { %196 = vmatprep.subr.bf16.mxu0 %v222_v2 }
   0xf   :  { %197 = vmatpush3.bf16.msra.mxu0 %v215_v11 }
  0x10   :  { %198 = vmatprep.subr.bf16.mxu0 %v222_v2 }
  0x13   :  { %199 = vmatpush3.bf16.msra.mxu0 %v216_v12 }
  0x14   :  { %200 = vmatprep.subr.bf16.mxu0 %v222_v2 }
  0x17   :  { %201 = vmatpush3.bf16.msra.mxu0 %v217_v13 }
  0x18   :  { %202 = vmatprep.subr.bf16.mxu0 %v222_v2 }
  0x1b   :  { %203 = vmatpush3.bf16.msra.mxu0 %v218_v14 }
  0x1c   :  { %204 = vmatprep.subr.bf16.mxu0 %v222_v2 }
  0x1f   :  { %205 = vmatpush3.bf16.msra.mxu0 %v219_v15 }
  0x90   :  { %v27_v5 = vpop.xlane.xlu0 %26 }
  0x91   :  { %v29_v6 = vmul.f32 0.0078125, %v27_v5 }
  0x93   :  { %v30_v7 = vsub.f32 %v21_v0, %v29_v6 }
  0x95   :  { %v31_v8 = vmul.f32 %v30_v7, %v30_v7 }
  0x97   :  { %v32_v9 = vsel %vm24_vm0, %v31_v8, 0.0 }
  0x98   :  { %33 = vadd.xlane.f32.xlu0 %v32_v9 }
 0x125   :  { %v34_v16 = vpop.xlane.xlu0 %33 }
 0x126   :  { %v35_v17 = vmul.f32 0.0078125, %v34_v16 }
 0x128   :  { %v36_v18 = vadd.f32 1e-05, %v35_v17 }
 0x12a   :  { %220 = vrsqrt.f32 %v36_v18 }
 0x134   :  { %v221_v19 = vpop.eup %220 }
 0x135   :  { %v38_v21 = vmul.f32 %v221_v19, %v30_v7 }
 0x137   :  { %v45_v23 = vmul.f32 %v170_v20, %v38_v21 }
 0x139   :  { %v52_v24 = vadd.f32 %v171_v22, %v45_v23 }
 0x13b   :  { %v53_v25 = vpack.c.bf16 %v52_v24, %v52_v24 }
 0x13d   :  { %207 = vmatmul.mubr.bf16.vlgmr.msra.gmra.mrb[0].mxu0 %v53_v25 }
 0x210   :  { %v159_v27 = vpop.f32.mrb[0].mxu0 }
 0x211   :  { %v160_v28 = vadd.f32 %v172_v26, %v159_v27  ;;  %v208_v29 = vpop.f32.mrb[1].mxu0 }
 0x212   :  { %v162_v30 = vpop.f32.mrb[2].mxu0 }
 0x213   :  { %165 = vst [vmem:[%s300_s5] sm:$0x3] %v160_v28  ;;  %v209_v31 = vpop.f32.mrb[3].mxu0 }

// kernel: vit_forward.4
= control target key start
LH: loop header
LB: loop body
LE: loop exit
PB: predicated region body
PF: predicated region fallthrough
CT: control target
= control target key end

     0   :  { %s3623_s0 = inlined_call_operand.vmem [shape: f32[2,8,128], index: 0, kind: input, shape index: {}, may-alias: {0,12}]   ;;  %s3624_s1 = inlined_call_operand.vmem [shape: f32[2,1,128], index: 1, kind: input, shape index: {}]   ;;  %s3625_s2 = inlined_call_operand.vmem [shape: f32[2,1,128], index: 2, kind: input, shape index: {}]   ;;  %s3626_s3 = inlined_call_operand.hbm [shape: bf16[2,128,384], index: 3, kind: input, shape index: {}]   ;;  %s3627_s4 = inlined_call_operand.hbm [shape: bf16[2,128,128], index: 4, kind: input, shape index: {}]   ;;  %s3628_s5 = inlined_call_operand.vmem [shape: f32[2,1,128], index: 5, kind: input, shape index: {}]   ;;  %s3629_s6 = inlined_call_operand.hbm [shape: f32[2,1,128], index: 6, kind: input, shape index: {}]   ;;  %s3630_s7 = inlined_call_operand.hbm [shape: f32[2,1,128], index: 7, kind: input, shape index: {}]   ;;  %s3631_s8 = inlined_call_operand.vmem [shape: bf16[2,128,512], index: 8, kind: input, shape index: {}]   ;;  %s3632_s9 = inlined_call_operand.hbm [shape: f32[2,1,512], index: 9, kind: input, shape index: {}]   ;;  %s3633_s10 = inlined_call_operand.hbm [shape: bf16[2,512,128], index: 10, kind: input, shape index: {}]   ;;  %s3634_s11 = inlined_call_operand.hbm [shape: f32[2,1,128], index: 11, kind: input, shape index: {}]   ;;  %s3635_s12 = inlined_call_operand.vmem [shape: f32[2,8,128], index: 12, kind: output, shape index: {}, may-alias: {0,12}]  }
   0x1   :  { %3649 = sst [smem:[#allocation25_spill]] %s3623_s0 }
   0x2   :  { %3650 = sst [smem:[#allocation26_spill]] %s3624_s1 }
   0x3   :  { %3651 = sst [smem:[#allocation27_spill]] %s3625_s2 }
   0x4   :  { %3652 = sst [smem:[#allocation28_spill]] %s3626_s3 }
   0x5   :  { %3653 = sst [smem:[#allocation29_spill]] %s3627_s4 }
   0x6   :  { %3654 = sst [smem:[#allocation30_spill]] %s3628_s5 }
   0x7   :  { %3655 = sst [smem:[#allocation31_spill]] %s3629_s6 }
   0x8   :  { %3656 = sst [smem:[#allocation32_spill]] %s3630_s7 }
   0x9   :  { %3657 = sst [smem:[#allocation33_spill]] %s3631_s8 }
   0xa   :  { %3658 = sst [smem:[#allocation34_spill]] %s3632_s9 }
   0xb   :  { %3659 = sst [smem:[#allocation35_spill]] %s3633_s10 }
   0xc   :  { %3660 = sst [smem:[#allocation36_spill]] %s3634_s11 }
   0xd   :  { %3661 = sst [smem:[#allocation37_spill]] %s3635_s12 }
   0xe   :  { %17 = vsyncpa [#allocation4], 0 }
   0xf   :  { %19 = vsyncpa [#allocation4 + $0x1], 0 }
  0x10   :  { %20 = vsyncpa [#allocation6], 0 }
  0x11   :  { %22 = vsyncpa [#allocation6 + $0x1], 0 }
  0x12   :  { %23 = vsyncpa [#allocation9], 0 }
  0x13   :  { %25 = vsyncpa [#allocation9 + $0x1], 0 }
  0x14   :  { %26 = vsyncpa [#allocation12], 0 }
  0x15   :  { %28 = vsyncpa [#allocation12 + $0x1], 0  ;;  %s3059_s21 = smov 0   ;;  %s3061_s22 = smov 0  }
  0x16   :  { %s3063_s23 = smov 0   ;;  %s3065_s24 = smov 0  }
  0x17   :  { %s3067_s25 = smov 0   ;;  %s3069_s26 = smov 0  }
  0x18   :  { %s3071_s27 = smov 0   ;;  %s3073_s28 = smov 0  }
  0x19 LB: > { %3662 = sst [smem:[#allocation18_spill]] %s2954_s22  ;;  %s3636_s29 = sadd.s32 4294967295, %s2978_s28   ;;  %s2978_s28 = sphi %s3073_s28, %s34_s28   ;;  %s2974_s27 = sphi %s3071_s27, %s3710_s27   ;;  %s2970_s26 = sphi %s3069_s26, %s3709_s26   ;;  %s2966_s25 = sphi %s3067_s25, %s3708_s25   ;;  %s2962_s24 = sphi %s3065_s24, %s3707_s24   ;;  %s2958_s23 = sphi %s3063_s23, %s3706_s23   ;;  %s2954_s22 = sphi %s3061_s22, %s3705_s22   ;;  %s2950_s21 = sphi %s3059_s21, %s3704_s21  }
  0x1a   : > { %3663 = sst [smem:[#allocation19_spill]] %s2958_s23  ;;  %s43_s30 = sadd.s32 1, %s2970_s26 }
  0x1b   : > { %3664 = sst [smem:[#allocation20_spill]] %s2970_s26  ;;  %p44_p0 = scmp.ge.s32.totalorder %s43_s30, 2 }
  0x1c   : > { %3665 = sst [smem:[#allocation21_spill]] %s2974_s27  ;;  %s46_s13 = sadd.s32 1, %s2974_s27 }
  0x1d   : > { %s131_s14 = sadd.s32 1, %s2958_s23  ;;  %p138_p1 = scmp.ne.s32.totalorder %s2958_s23, %s2954_s22 }
  0x1e   : > { %s3712_s30 = smov (%p44_p0, %s43_s30), 0  ;;  %s3714_s13 = smov (!%p44_p0, %s46_s13), %s2974_s27 }
  0x1f   : > { %3666 = sst [smem:[#allocation22_spill]] %s3712_s30  ;;  %s128_s15 = ssub.s32 %s2970_s26, %s3712_s30 }
  0x20   : > { %p139_p2 = scmp.eq.s32.totalorder %s2978_s28, 0  ;;  %p48_p3 = scmp.ge.s32.totalorder %s3714_s13, 2 }
  0x21   : > { %p129_p4 = scmp.eq.s32.totalorder %s128_s15, 0  ;;  %p144_p6 = scmp.ne.s32.totalorder %s2954_s22, %s2950_s21 }
  0x22   : > { %p140_p5 = por %p139_p2, %p138_p1  ;;  %s3716_s13 = smov (%p48_p3, %s3714_s13), 0 }
  0x23   : > { %3667 = sst [smem:[#allocation23_spill]] %s3716_s13  ;;  %p145_p7 = scmp.eq.s32.totalorder %s3636_s29, 0 }
  0x24   : > { %s3113_s16 = scalar_select %p129_p4, %s2958_s23, %s131_s14  }
  0x25   : > { %p2482_p8 = scmp.lt.s32.totalorder %s2978_s28, 4  ;;  %s3119_s17 = sand.u32 1, %s2958_s23  }
  0x26   : > { %3668 = sst [smem:[#allocation24_spill]] %s3113_s16  ;;  %p3121_p9 = por %p145_p7, %p144_p6 }
  0x27   : > { %s3126_s19 = sand.u32 1, %s2978_s28   ;;  %p3128_p10 = pnand %p2482_p8, %p140_p5 }
  0x28   : > { %s3669_s18 = scalar_select %p3121_p9, 1, 0 }
  0x29   : > { %s3670_s20 = scalar_select %p3128_p10, 1, 0 }
  0x2a   : > { %s2195_s21 = sshll.u32 %s3119_s17, 6  ;;  %s2321_s14 = sshll.u32 %s2970_s26, 10 }
  0x2b   : > { %s3671_s4 = sld [smem:[#allocation29_spill]]  ;;  %s446_s30 = scalar_lea.vmem [#allocation5], %s2195_s21 }
  0x2c   : > { %s453_s27 = sshll.u32 %s446_s30, 4  ;;  %p3147_p13 = pneg %p3128_p10  ;;  %s3139_s27 = int_to_ptr.vmem [resolvable:$true] %s453_s27 }
  0x31   : > { %s3137_s13 = scalar_lea.hbm %s3671_s4, %s2321_s14  ;;  %s2695_s21 = scalar_lea.hbm %s3671_s4, 2048 }
  0x32   : > { %s2690_s23 = scalar_lea.hbm %s3137_s13, 1024  ;;  %p2696_p2 = scmp.lt.u32.totalorder %s3137_s13, %s3671_s4 }
  0x33   : > { %p2691_p12 = scmp.ne.s32.totalorder %s3137_s13, %s2690_s23  ;;  %p2697_p3 = scmp.lt.u32.totalorder %s2695_s21, %s2690_s23 }
  0x34   : > { %p2699_p5 = scmp.lt.u32.totalorder %s2690_s23, %s3137_s13 }
  0x35   : > { %p2693_p0 = pnand %p3147_p13, %p2691_p12  ;;  %p2698_p4 = por %p2697_p3, %p2696_p2 }
  0x37   : > { %p2694_p1 = pneg %p2693_p0  ;;  %p2700_p6 = por %p2699_p5, %p2698_p4 }
  0x39   : > { %p2701_p7 = pnand %p2700_p6, %p2694_p1 }
  0x3b   : > { %2704 = shalt.err (!%p2701_p7)
}
  0x3c   : > { %s2705_s16 = scalar_lea.vmem %s3139_s27, 1024  ;;  %s2980_s29 = smov [#allocation5]  }
  0x3d   : > { %p2706_p8 = scmp.ne.s32.totalorder %s3139_s27, %s2705_s16  ;;  %s2710_s14 = sshll.u32 %s2980_s29, 4  ;;  %s2711_s14 = int_to_ptr.vmem [resolvable:$false] %s2710_s14 }
  0x3e   : > { %s2712_s30 = scalar_lea.vmem %s2711_s14, 2048  ;;  %p2713_p11 = scmp.lt.s32.totalorder %s3139_s27, %s2711_s14 }
  0x3f   : > { %p2708_p12 = pnand %p2706_p8, %p3147_p13  ;;  %p2714_p9 = scmp.lt.s32.totalorder %s2712_s30, %s2705_s16 }
  0x41   : > { %p2709_p0 = pneg %p2708_p12  ;;  %p2715_p2 = por %p2714_p9, %p2713_p11 }
  0x43   : > { %p2716_p3 = pnand %p2715_p2, %p2709_p0 }
  0x45   : > { %2719 = shalt.err (!%p2716_p3)
}
  0x46   : > { %s3641_s23 = smov 64   ;;  %s3642_s21 = smov 4  }
  0x47   : > { %s3673_s16 = scalar_lea.sflag [#allocation6], %s3126_s19  ;;  %p566_p9 = scmp.lt.s32.totalorder %s2978_s28, 5 }
  0x48   : > { %2466 = dma.hbm_to_vmem [thread:$0]  (!%p3128_p10), %s3137_s13, 1024, %s3139_s27, %s3673_s16, %s3641_s23, %s3641_s23, %s3642_s21  }
  0x49   : > { %s3177_s15 = sshll.u32 %s2970_s26, 4  ;;  %p3674_p11 = scmp.ge.s32.totalorder %s2978_s28, 1 }
  0x4a   : > { %s3676_s7 = sld [smem:[#allocation32_spill]]  ;;  %s489_s12 = scalar_lea.vmem [#allocation8], %s3119_s17 }
  0x4b   : > { %p3181_p1 = pnand %p3674_p11, %p566_p9  ;;  %s496_s27 = sshll.u32 %s489_s12, 4  ;;  %s3192_s27 = int_to_ptr.vmem [resolvable:$true] %s496_s27 }
  0x4c   : > { %s2203_s13 = sshll.u32 %s3119_s17, 8  ;;  %s3643_s16 = scalar_lea.sflag [#allocation9], %s3126_s19 }
  0x4d   : > { %s3675_s29 = scalar_select %p3181_p1, 1, 0 }
  0x50   : > { %s3189_s4 = scalar_lea.hbm %s3676_s7, %s3177_s15  ;;  %s2725_s14 = scalar_lea.hbm %s3676_s7, 32 }
  0x51   : > { %s2720_s23 = scalar_lea.hbm %s3189_s4, 16  ;;  %p2726_p7 = scmp.lt.u32.totalorder %s3189_s4, %s3676_s7 }
  0x52   : > { %p2721_p4 = scmp.ne.s32.totalorder %s3189_s4, %s2720_s23  ;;  %p2727_p8 = scmp.lt.u32.totalorder %s2725_s14, %s2720_s23 }
  0x53   : > { %p2729_p0 = scmp.lt.u32.totalorder %s2720_s23, %s3189_s4 }
  0x54   : > { %p2723_p5 = pnand %p2721_p4, %p3147_p13  ;;  %p2728_p12 = por %p2727_p8, %p2726_p7 }
  0x56   : > { %p2724_p6 = pneg %p2723_p5  ;;  %p2730_p2 = por %p2729_p0, %p2728_p12 }
  0x58   : > { %p2731_p3 = pnand %p2730_p2, %p2724_p6 }
  0x5a   : > { %2734 = shalt.err (!%p2731_p3)
}
  0x5b   : > { %s2735_s12 = scalar_lea.vmem %s3192_s27, 16  ;;  %s2983_s5 = smov [#allocation8]  }
  0x5c   : > { %p2736_p9 = scmp.ne.s32.totalorder %s3192_s27, %s2735_s12  ;;  %s2740_s21 = sshll.u32 %s2983_s5, 4  ;;  %s2741_s21 = int_to_ptr.vmem [resolvable:$false] %s2740_s21 }
  0x5d   : > { %s2742_s2 = scalar_lea.vmem %s2741_s21, 32  ;;  %p2743_p5 = scmp.lt.s32.totalorder %s3192_s27, %s2741_s21 }
  0x5e   : > { %p2738_p11 = pnand %p2736_p9, %p3147_p13  ;;  %p2744_p1 = scmp.lt.s32.totalorder %s2742_s2, %s2735_s12 }
  0x60   : > { %p2739_p4 = pneg %p2738_p11  ;;  %p2745_p7 = por %p2744_p1, %p2743_p5 }
  0x62   : > { %p2746_p8 = pnand %p2745_p7, %p2739_p4 }
  0x64   : > { %2749 = shalt.err (!%p2746_p8)
}
  0x65   : > { %2472 = dma.hbm_to_vmem [thread:$0]  (!%p3128_p10), %s3189_s4, 16, %s3192_s27, %s3643_s16  }
  0x66   : > { %s2323_s23 = sshll.u32 %s2970_s26, 12  ;;  %s3677_s10 = sld [smem:[#allocation35_spill]] }
  0x67   : > { %s534_s12 = scalar_lea.vmem [#allocation11], %s2203_s13  ;;  %s3644_s2 = scalar_lea.sflag [#allocation12], %s3126_s19 }
  0x68   : > { %s541_s21 = sshll.u32 %s534_s12, 4  ;;  %s3227_s21 = int_to_ptr.vmem [resolvable:$true] %s541_s21 }
  0x6c   : > { %s3223_s5 = scalar_lea.hbm %s3677_s10, %s2323_s23  ;;  %s2755_s23 = scalar_lea.hbm %s3677_s10, 8192 }
  0x6d   : > { %s2750_s7 = scalar_lea.hbm %s3223_s5, 4096  ;;  %p2756_p0 = scmp.lt.u32.totalorder %s3223_s5, %s3677_s10 }
  0x6e   : > { %p2751_p1 = scmp.ne.s32.totalorder %s3223_s5, %s2750_s7  ;;  %p2757_p2 = scmp.lt.u32.totalorder %s2755_s23, %s2750_s7 }
  0x6f   : > { %p2759_p9 = scmp.lt.u32.totalorder %s2750_s7, %s3223_s5 }
  0x70   : > { %p2753_p6 = pnand %p2751_p1, %p3147_p13  ;;  %p2758_p3 = por %p2757_p2, %p2756_p0 }
  0x72   : > { %p2754_p12 = pneg %p2753_p6  ;;  %p2760_p11 = por %p2759_p9, %p2758_p3 }
  0x74   : > { %p2761_p4 = pnand %p2760_p11, %p2754_p12 }
  0x76   : > { %2764 = shalt.err (!%p2761_p4)
}
  0x77   : > { %s2765_s13 = scalar_lea.vmem %s3227_s21, 4096  ;;  %s2984_s12 = smov [#allocation11]  }
  0x78   : > { %p2766_p5 = scmp.ne.s32.totalorder %s3227_s21, %s2765_s13  ;;  %s2770_s4 = sshll.u32 %s2984_s12, 4  ;;  %s2771_s4 = int_to_ptr.vmem [resolvable:$false] %s2770_s4 }
  0x79   : > { %s2772_s27 = scalar_lea.vmem %s2771_s4, 8192  ;;  %p2773_p1 = scmp.lt.s32.totalorder %s3227_s21, %s2771_s4 }
  0x7a   : > { %p2768_p7 = pnand %p2766_p5, %p3147_p13  ;;  %p2774_p6 = scmp.lt.s32.totalorder %s2772_s27, %s2765_s13 }
  0x7c   : > { %p2769_p8 = pneg %p2768_p7  ;;  %p2775_p0 = por %p2774_p6, %p2773_p1 }
  0x7e   : > { %p2776_p2 = pnand %p2775_p0, %p2769_p8 }
  0x80   : > { %2779 = shalt.err (!%p2776_p2)
}
  0x81   : > { %s3678_s7 = smov 4   ;;  %s3679_s23 = smov 64  }
  0x82   : > { %2478 = dma.hbm_to_vmem [thread:$0]  (!%p3128_p10), %s3223_s5, 4096, %s3227_s21, %s3644_s2, %s3679_s23, %s3679_s23, %s3678_s7  }
  0x83   : > { %s2443_s14 = smul.u32 192, %s3119_s17  ;;  %s3680_s3 = sld [smem:[#allocation28_spill]] }
  0x84   : > { %s2444_s30 = smul.u32 3072, %s2970_s26  ;;  %s3681_s6 = sld [smem:[#allocation31_spill]] }
  0x85   : > { %s425_s27 = scalar_lea.vmem [#allocation3], %s2443_s14  ;;  %s422_s5 = scalar_lea.sflag [#allocation4], %s3119_s17 }
  0x86   : > { %s432_s16 = sshll.u32 %s425_s27, 4  ;;  %s3263_s16 = int_to_ptr.vmem [resolvable:$true] %s432_s16 }
  0x89   : > { %s3261_s4 = scalar_lea.hbm %s3680_s3, %s2444_s30  ;;  %s2785_s30 = scalar_lea.hbm %s3680_s3, 6144 }
  0x8a   : > { %s3269_s0 = scalar_lea.hbm %s3681_s6, %s3177_s15  ;;  %s2780_s21 = scalar_lea.hbm %s3261_s4, 3072 }
  0x8b   : > { %p2781_p12 = scmp.ne.s32.totalorder %s3261_s4, %s2780_s21  ;;  %p2786_p11 = scmp.lt.u32.totalorder %s3261_s4, %s3680_s3 }
  0x8c   : > { %p2787_p4 = scmp.lt.u32.totalorder %s2785_s30, %s2780_s21  ;;  %p2789_p7 = scmp.lt.u32.totalorder %s2780_s21, %s3261_s4 }
  0x8d   : > { %p2783_p3 = pnand %p2781_p12, %p3147_p13 }
  0x8e   : > { %p2788_p5 = por %p2787_p4, %p2786_p11 }
  0x8f   : > { %p2784_p9 = pneg %p2783_p3 }
  0x90   : > { %p2790_p8 = por %p2789_p7, %p2788_p5 }
  0x92   : > { %p2791_p1 = pnand %p2790_p8, %p2784_p9 }
  0x94   : > { %2794 = shalt.err (!%p2791_p1)
}
  0x95   : > { %s2795_s1 = scalar_lea.vmem %s3263_s16, 3072  ;;  %s2985_s10 = smov [#allocation3]  }
  0x96   : > { %p2796_p6 = scmp.ne.s32.totalorder %s3263_s16, %s2795_s1  ;;  %s2800_s12 = sshll.u32 %s2985_s10, 4  ;;  %s2801_s12 = int_to_ptr.vmem [resolvable:$false] %s2800_s12 }
  0x97   : > { %s2802_s27 = scalar_lea.vmem %s2801_s12, 6144  ;;  %p2803_p12 = scmp.lt.s32.totalorder %s3263_s16, %s2801_s12 }
  0x98   : > { %p2798_p0 = pnand %p2796_p6, %p3147_p13  ;;  %p2804_p3 = scmp.lt.s32.totalorder %s2802_s27, %s2795_s1 }
  0x9a   : > { %p2799_p2 = pneg %p2798_p0  ;;  %p2805_p11 = por %p2804_p3, %p2803_p12 }
  0x9c   : > { %p2806_p4 = pnand %p2805_p11, %p2799_p2 }
  0x9e   : > { %2809 = shalt.err (!%p2806_p4)
}
  0x9f   : > { %s2986_s21 = smov 192   ;;  %s2987_s7 = smov 12  }
  0xa0   : > { %2463 = dma.hbm_to_vmem [thread:$0]  (!%p3128_p10), %s3261_s4, 3072, %s3263_s16, %s422_s5, %s2986_s21, %s2986_s21, %s2987_s7  }
  0xa1   : > { %s472_s23 = scalar_lea.vmem [#allocation7], %s3119_s17  ;;  %s2200_s13 = sshll.u32 %s3119_s17, 2 }
  0xa2   : > { %s479_s30 = sshll.u32 %s472_s23, 4  ;;  %s2810_s14 = scalar_lea.hbm %s3269_s0, 16  ;;  %s480_s30 = int_to_ptr.vmem [resolvable:$true] %s479_s30 }
  0xa3   : > { %p2811_p9 = scmp.ne.s32.totalorder %s3269_s0, %s2810_s14  ;;  %s2815_s12 = scalar_lea.hbm %s3681_s6, 32 }
  0xa4   : > { %p2816_p8 = scmp.lt.u32.totalorder %s3269_s0, %s3681_s6  ;;  %p2817_p1 = scmp.lt.u32.totalorder %s2815_s12, %s2810_s14 }
  0xa5   : > { %p2813_p5 = pnand %p2811_p9, %p3147_p13  ;;  %p2819_p0 = scmp.lt.u32.totalorder %s2810_s14, %s3269_s0 }
  0xa6   : > { %p2818_p6 = por %p2817_p1, %p2816_p8 }
  0xa7   : > { %p2814_p7 = pneg %p2813_p5 }
  0xa8   : > { %p2820_p2 = por %p2819_p0, %p2818_p6 }
  0xaa   : > { %p2821_p12 = pnand %p2820_p2, %p2814_p7 }
  0xac   : > { %2824 = shalt.err (!%p2821_p12)
}
  0xad   : > { %s2825_s16 = scalar_lea.vmem %s480_s30, 16  ;;  %s2988_s4 = smov [#allocation7]  }
  0xae   : > { %p2826_p3 = scmp.ne.s32.totalorder %s480_s30, %s2825_s16  ;;  %s2830_s5 = sshll.u32 %s2988_s4, 4  ;;  %s2831_s5 = int_to_ptr.vmem [resolvable:$false] %s2830_s5 }
  0xaf   : > { %s2832_s21 = scalar_lea.vmem %s2831_s5, 32  ;;  %p2833_p9 = scmp.lt.s32.totalorder %s480_s30, %s2831_s5 }
  0xb0   : > { %p2828_p11 = pnand %p2826_p3, %p3147_p13  ;;  %p2834_p5 = scmp.lt.s32.totalorder %s2832_s21, %s2825_s16 }
  0xb2   : > { %p2829_p4 = pneg %p2828_p11  ;;  %p2835_p10 = por %p2834_p5, %p2833_p9 }
  0xb4   : > { %p2836_p1 = pnand %p2835_p10, %p2829_p4 }
  0xb6   : > { %2839 = shalt.err (!%p2836_p1)
}
  0xb7   : > { %p3682_p8 = scmp.ne.s32.totalorder %s3670_s20, 0  ;;  %s3683_s2 = scalar_lea.sflag [#allocation6], %s3126_s19 }
  0xb8   : > { %s2322_s7 = sshll.u32 %s2970_s26, 6  ;;  %s515_s23 = scalar_lea.vmem [#allocation10], %s2200_s13 }
  0xb9   : > { %2469 = dma.hbm_to_vmem [thread:$0]  (!%p3682_p8), %s3269_s0, 16, %s480_s30, %s3683_s2  }
  0xba   : > { %s523_s14 = sshll.u32 %s515_s23, 4  ;;  %s3684_s9 = sld [smem:[#allocation34_spill]]  ;;  %s524_s14 = int_to_ptr.vmem [resolvable:$true] %s523_s14 }
  0xc0   : > { %s521_s12 = scalar_lea.hbm %s3684_s9, %s2322_s7  ;;  %s2845_s5 = scalar_lea.hbm %s3684_s9, 128 }
  0xc1   : > { %s2840_s27 = scalar_lea.hbm %s521_s12, 64  ;;  %p2846_p0 = scmp.lt.u32.totalorder %s521_s12, %s3684_s9 }
  0xc2   : > { %p2841_p10 = scmp.ne.s32.totalorder %s521_s12, %s2840_s27  ;;  %p2847_p2 = scmp.lt.u32.totalorder %s2845_s5, %s2840_s27 }
  0xc3   : > { %p2849_p3 = scmp.lt.u32.totalorder %s2840_s27, %s521_s12 }
  0xc4   : > { %p2843_p7 = pnand %p2841_p10, %p3147_p13  ;;  %p2848_p12 = por %p2847_p2, %p2846_p0 }
  0xc6   : > { %p2844_p6 = pneg %p2843_p7  ;;  %p2850_p11 = por %p2849_p3, %p2848_p12 }
  0xc8   : > { %p2851_p4 = pnand %p2850_p11, %p2844_p6 }
  0xca   : > { %2854 = shalt.err (!%p2851_p4)
}
  0xcb   : > { %s2855_s30 = scalar_lea.vmem %s524_s14, 64  ;;  %s2989_s13 = smov [#allocation10]  }
  0xcc   : > { %p2856_p9 = scmp.ne.s32.totalorder %s524_s14, %s2855_s30  ;;  %s2860_s2 = sshll.u32 %s2989_s13, 4  ;;  %s2861_s2 = int_to_ptr.vmem [resolvable:$false] %s2860_s2 }
  0xcd   : > { %s2862_s7 = scalar_lea.vmem %s2861_s2, 128  ;;  %p2863_p10 = scmp.lt.s32.totalorder %s524_s14, %s2861_s2 }
  0xce   : > { %p2858_p5 = pnand %p2856_p9, %p3147_p13  ;;  %p2864_p7 = scmp.lt.s32.totalorder %s2862_s7, %s2855_s30 }
  0xd0   : > { %p2859_p1 = pneg %p2858_p5  ;;  %p2865_p8 = por %p2864_p7, %p2863_p10 }
  0xd2   : > { %p2866_p0 = pnand %p2865_p8, %p2859_p1 }
  0xd4   : > { %2869 = shalt.err (!%p2866_p0)
}
  0xd5   : > { %p3685_p2 = scmp.ne.s32.totalorder %s3670_s20, 0  ;;  %s3686_s23 = scalar_lea.sflag [#allocation9], %s3126_s19 }
  0xd6   : > { %s3687_s11 = sld [smem:[#allocation36_spill]]  ;;  %s554_s16 = scalar_lea.vmem [#allocation13], %s3119_s17 }
  0xd7   : > { %2475 = dma.hbm_to_vmem [thread:$0]  (!%p3685_p2), %s521_s12, 64, %s524_s14, %s3686_s23  }
  0xd8   : > { %s561_s4 = sshll.u32 %s554_s16, 4  ;;  %s562_s4 = int_to_ptr.vmem [resolvable:$true] %s561_s4 }
  0xdc   : > { %s3340_s27 = scalar_lea.hbm %s3687_s11, %s3177_s15  ;;  %s2875_s14 = scalar_lea.hbm %s3687_s11, 32 }
  0xdd   : > { %s2870_s5 = scalar_lea.hbm %s3340_s27, 16  ;;  %p2876_p3 = scmp.lt.u32.totalorder %s3340_s27, %s3687_s11 }
  0xde   : > { %p2871_p8 = scmp.ne.s32.totalorder %s3340_s27, %s2870_s5  ;;  %p2877_p11 = scmp.lt.u32.totalorder %s2875_s14, %s2870_s5 }
  0xdf   : > { %p2879_p9 = scmp.lt.u32.totalorder %s2870_s5, %s3340_s27 }
  0xe0   : > { %p2873_p6 = pnand %p2871_p8, %p3147_p13  ;;  %p2878_p4 = por %p2877_p11, %p2876_p3 }
  0xe2   : > { %p2874_p12 = pneg %p2873_p6  ;;  %p2880_p5 = por %p2879_p9, %p2878_p4 }
  0xe4   : > { %p2881_p1 = pnand %p2880_p5, %p2874_p12 }
  0xe6   : > { %2884 = shalt.err (!%p2881_p1)
}
  0xe7   : > { %s2885_s17 = scalar_lea.vmem %s562_s4, 16  ;;  %s2990_s15 = smov [#allocation13]  }
  0xe8   : > { %p2886_p10 = scmp.ne.s32.totalorder %s562_s4, %s2885_s17  ;;  %s2890_s13 = sshll.u32 %s2990_s15, 4  ;;  %s2891_s13 = int_to_ptr.vmem [resolvable:$false] %s2890_s13 }
  0xe9   : > { %s2892_s2 = scalar_lea.vmem %s2891_s13, 32  ;;  %p2893_p8 = scmp.lt.s32.totalorder %s562_s4, %s2891_s13 }
  0xea   : > { %p2888_p7 = pnand %p2886_p10, %p3147_p13  ;;  %p2894_p6 = scmp.lt.s32.totalorder %s2892_s2, %s2885_s17 }
  0xec   : > { %p2889_p0 = pneg %p2888_p7  ;;  %p2895_p2 = por %p2894_p6, %p2893_p8 }
  0xee   : > { %p2896_p3 = pnand %p2895_p2, %p2889_p0 }
  0xf0   : > { %2899 = shalt.err (!%p2896_p3)
}
  0xf1   : > { %p3688_p11 = scmp.ne.s32.totalorder %s3670_s20, 0  ;;  %s3689_s7 = scalar_lea.sflag [#allocation12], %s3126_s19 }
  0xf2   : > { %p3690_p12 = scmp.ne.s32.totalorder %s3675_s29, 0 }
  0xf3   : > { %2481 = dma.hbm_to_vmem [thread:$0]  (!%p3688_p11), %s3340_s27, 16, %s562_s4, %s3689_s7  }
  0xf4   : > { %570 = sbr.rel (%p3690_p12) target bundleno = 2562 (0xa02), region = 68  ;;  %s3365_s8 = sand.u32 (!%p3690_p12), 1, %s2954_s22  }
  0xf5   : > { %s2445_s23 = smul.u32 (!%p3690_p12), 192, %s3365_s8  ;;  %s573_s1 = scalar_lea.sflag (!%p3690_p12), [#allocation4], %s3365_s8 }
  0xf6   : > { %p3691_p13 = scmp.ne.s32.totalorder (!%p3690_p12), %s3669_s18, 0 }
  0xf7   : > { %s3369_s10 = scalar_lea.vmem (!%p3690_p12), [#allocation3], %s2445_s23 }
  0xfb   : > { %2933 = dma.done.wait (%p3691_p13), %s573_s1, 3072  }
  0xfc   : > { %2935 = vsyncadd (%p3691_p13), %s573_s1, 4294964224  ;;  %s3692_s19 = sadd.s32 4294967295, %s2978_s28   ;;  %s2208_s29 = sshll.u32 %s3365_s8, 6 }
  0xfd   : > { %s581_s20 = sand.u32 1, %s3692_s19   ;;  %s3378_s16 = scalar_lea.vmem [#allocation5], %s2208_s29 }
  0xfe   : > { %s582_s27 = scalar_lea.sflag [#allocation6], %s581_s20 }
  0xff   : > { %2937 = dma.done.wait (%p3691_p13), %s582_s27, 1040  }
 0x100   : > { %2939 = vsyncadd (%p3691_p13), %s582_s27, 4294966256  ;;  %s599_s5 = scalar_lea.sflag [#allocation9], %s581_s20 }
 0x101   : > { %2941 = dma.done.wait (%p3691_p13), %s599_s5, 80  }
 0x102   : > { %2943 = vsyncadd (%p3691_p13), %s599_s5, 4294967216  ;;  %s2209_s0 = sshll.u32 %s3365_s8, 2  ;;  %s2210_s14 = sshll.u32 %s3365_s8, 8 }
 0x103   : > { %s3392_s12 = scalar_lea.vmem [#allocation10], %s2209_s0  ;;  %s616_s30 = scalar_lea.sflag [#allocation12], %s581_s20 }
 0x104   : > { %s3394_s17 = scalar_lea.vmem [#allocation11], %s2210_s14 }
 0x105   : > { %2945 = dma.done.wait (%p3691_p13), %s616_s30, 4112  }
 0x106   : > { %2947 = vsyncadd (%p3691_p13), %s616_s30, 4294963184  ;;  %p712_p2 = scmp.lt.s32.totalorder %s2966_s25, 1  ;;  %p716_p4 = scmp.lt.s32.totalorder %s2962_s24, 1 }
 0x107   : > { %s3693_s23 = sld [smem:[#allocation25_spill]]  ;;  %s3694_s20 = sld [smem:[#allocation26_spill]] }
 0x108   : > { %s3718_s25 = smov (!%p712_p2, %s2966_s25), 1  ;;  %s3695_s0 = sld [smem:[#allocation27_spill]] }
 0x109   : > { %s3404_s15 = scalar_select %p716_p4, %s2962_s24, 1 }
 0x10a   : > { %s2211_s13 = sshll.u32 %s3718_s25, 3  ;;  %s3696_s4 = sld [smem:[#allocation30_spill]] }
 0x10b   : > { %s2324_s6 = sshll.u32 %s3404_s15, 8  ;;  %s3697_s25 = sld [smem:[#allocation37_spill]] }
 0x10c   : > { %s627_s1 = scalar_lea.vmem [#allocation13], %s3365_s8  ;;  %p2215_p9 = scmp.ne.s32.totalorder %s2962_s24, 0 }
 0x10d   : > { %s715_s18 = scalar_lea.vmem %s3693_s23, %s2211_s13  ;;  %s718_s29 = scalar_lea.vmem %s3694_s20, %s3404_s15 }
 0x10e   : > { %s721_s14 = scalar_lea.vmem %s3695_s0, %s3404_s15  ;;  %s3698_s23 = sld [smem:[#allocation33_spill]]  ;;  %v739_v0 = vld [vmem:[%s715_s18] sm:$0xff] (!%p2215_p9) }
 0x10f   : > { %738 = sbr.rel (%p2215_p9) target bundleno = 278 (0x116), region = 100 }
 0x110   : > { %s724_s3 = scalar_lea.vmem %s3696_s4, %s3404_s15 }
 0x111   : > { %s3425_s26 = scalar_lea.vmem %s3697_s25, %s2211_s13 }
 0x112   : > { %740 = vst [vmem:[%s3425_s26] sm:$0xff] (!%p2215_p9), %v739_v0 }
 0x114   : > { %s3430_s22 = scalar_lea.vmem %s3698_s23, %s2324_s6 }
 0x116 PF: > { %v2554_v2 = vld [vmem:[%s3369_s10 + $0x4] ss:$12 sps:$4 sm:$0xff]   ;;  %v2556_v3 = vld [vmem:[%s3369_s10] ss:$12 sps:$4 sm:$0xff]   ;;  %v2991_v4 = vmov 0.0   ;;  %v2992_v26 = vmov 0   ;;  %v1012_v54 = vlaneseq }
 0x117   : > { %2391 = vmatprep.subr.bf16.mxu1 %v2991_v4  ;;  %v2557_v5 = vld [vmem:[%s3369_s10 + $0x8] ss:$12 sps:$4 sm:$0xff]   ;;  %v2560_v7 = vld [vmem:[%s3369_s10 + $0x18] ss:$12 sps:$4 sm:$0xff]   ;;  %931 = vmatprep.subr.bf16.mxu0 %v2554_v2  ;;  %v2561_v8 = vld [vmem:[%s3369_s10 + $0x20] ss:$12 sps:$4 sm:$0xff]  }
 0x118   : > { %v2558_v6 = vld [vmem:[%s3369_s10 + $0x1c] ss:$12 sps:$4 sm:$0xff]   ;;  %v2562_v9 = vld [vmem:[%s3369_s10 + $0x34] ss:$12 sps:$4 sm:$0xff]   ;;  %932 = vmatpush1.bf16.msra.mxu0 %v2556_v3  ;;  %2392 = vmatpush3.bf16.msra.mxu1 %v2557_v5  ;;  %v2565_v15 = vld [vmem:[%s3369_s10 + $0x38] ss:$12 sps:$4 sm:$0xff]  }
 0x119   : > { %v3436_v1 = vld [vmem:[%s3425_s26] sm:$0xff]  ;;  %933 = vmatprep.subr.bf16.mxu0 %v2558_v6  ;;  %2393 = vmatprep.subr.bf16.mxu1 %v2991_v4  ;;  %v2566_v16 = vld [vmem:[%s3369_s10 + $0x4c] ss:$12 sps:$4 sm:$0xff]   ;;  %v2568_v17 = vld [vmem:[%s3369_s10 + $0x48] ss:$12 sps:$4 sm:$0xff]   ;;  %vm2993_vm0 = vmmov 0  }
 0x11a   : > { %744 = vadd.xlane.f32.xlu0 %v3436_v1  ;;  %v2564_v14 = vld [vmem:[%s3369_s10 + $0x30] ss:$12 sps:$4 sm:$0xff]   ;;  %v2572_v20 = vld [vmem:[%s3369_s10 + $0x60] ss:$12 sps:$4 sm:$0xff]   ;;  %v2573_v21 = vld [vmem:[%s3369_s10 + $0x68] ss:$12 sps:$4 sm:$0xff]   ;;  %963 = vmatprep.mubr.bf16.mxu0 %v2992_v26 }
 0x11b   : > { %v2569_v18 = vld [vmem:[%s3369_s10 + $0x50] ss:$12 sps:$4 sm:$0xff]   ;;  %v2576_v23 = vld [vmem:[%s3369_s10 + $0x78] ss:$12 sps:$4 sm:$0xff]   ;;  %v2577_v24 = vld [vmem:[%s3369_s10 + $0x80] ss:$12 sps:$4 sm:$0xff]   ;;  %2407 = vmatprep.mubr.msk.bf16.mxu1 %vm2993_vm0, %v2991_v4 }
 0x11c   : > { %934 = vmatpush1.bf16.msra.mxu0 %v2560_v7  ;;  %2394 = vmatpush3.bf16.msra.mxu1 %v2561_v8  ;;  %v2570_v19 = vld [vmem:[%s3369_s10 + $0x64] ss:$12 sps:$4 sm:$0xff]   ;;  %v2574_v22 = vld [vmem:[%s3369_s10 + $0x7c] ss:$12 sps:$4 sm:$0xff]   ;;  %v2578_v25 = vld [vmem:[%s3369_s10 + $0x94] ss:$12 sps:$4 sm:$0xff]  }
 0x11d   : > { %935 = vmatprep.subr.bf16.mxu0 %v2562_v9  ;;  %2395 = vmatprep.subr.bf16.mxu1 %v2991_v4  ;;  %v2580_v27 = vld [vmem:[%s3369_s10 + $0x90] ss:$12 sps:$4 sm:$0xff]   ;;  %v2581_v28 = vld [vmem:[%s3369_s10 + $0x98] ss:$12 sps:$4 sm:$0xff]   ;;  %v2584_v30 = vld [vmem:[%s3369_s10 + $0xa8] ss:$12 sps:$4 sm:$0xff]  }
 0x11e   : > { %v2582_v29 = vld [vmem:[%s3369_s10 + $0xac] ss:$12 sps:$4 sm:$0xff]   ;;  %v2585_v31 = vld [vmem:[%s3369_s10 + $0xb0] ss:$12 sps:$4 sm:$0xff]   ;;  %vm1075_vm1 = vcmask 1043456   ;;  %v1013_v55 = vand.u32 127, %v1012_v54 }
 0x11f   : > { %v2216_v36 = vld [vmem:[%s718_s29] ss:$0 sm:$0xff]  ;;  %vm1059_vm3 = vcmask 64512   ;;  %v2586_v5 = vld [vmem:[%s3378_s16] sm:$0xff]   ;;  %v2587_v6 = vld [vmem:[%s3378_s16 + $0x8] sm:$0xff]   ;;  %s3703_s15 = scalar_lea.vmem [#allocation8], %s3365_s8 }
 0x120   : > { %936 = vmatpush1.bf16.msra.mxu0 %v2564_v14  ;;  %2396 = vmatpush3.bf16.msra.mxu1 %v2565_v15  ;;  %v2217_v38 = vld [vmem:[%s721_s14] ss:$0 sm:$0xff]  ;;  %vm1014_vm2 = vcmp.lt.s32.totalorder %v1013_v55, 5  ;;  %v2588_v7 = vld [vmem:[%s3378_s16 + $0x10] sm:$0xff]   ;;  %v2590_v9 = vld [vmem:[%s3378_s16 + $0x20] sm:$0xff]  }
 0x121   : > { %2397 = vmatprep.subr.bf16.mxu1 %v2991_v4  ;;  %937 = vmatprep.subr.bf16.mxu0 %v2566_v16  ;;  %v2589_v8 = vld [vmem:[%s3378_s16 + $0x18] sm:$0xff]   ;;  %v2591_v14 = vld [vmem:[%s3378_s16 + $0x28] sm:$0xff]   ;;  %v2592_v15 = vld [vmem:[%s3378_s16 + $0x30] sm:$0xff]  }
 0x122   : > { %v2593_v16 = vld [vmem:[%s3378_s16 + $0x38] sm:$0xff]  }
 0x123   : > { %v2624_v55 = vld [vmem:[%s3430_s22 + $0xa0] ss:$16 sps:$4 sm:$0xff]  }
 0x124   : > { %938 = vmatpush1.bf16.msra.mxu0 %v2568_v17  ;;  %2398 = vmatpush3.bf16.msra.mxu1 %v2569_v18 }
 0x125   : > { %2399 = vmatprep.subr.bf16.mxu1 %v2991_v4  ;;  %939 = vmatprep.subr.bf16.mxu0 %v2570_v19 }
 0x128   : > { %940 = vmatpush1.bf16.msra.mxu0 %v2572_v20  ;;  %2400 = vmatpush3.bf16.msra.mxu1 %v2573_v21 }
 0x129   : > { %941 = vmatprep.subr.bf16.mxu0 %v2574_v22  ;;  %2401 = vmatprep.subr.bf16.mxu1 %v2991_v4 }
 0x12c   : > { %942 = vmatpush1.bf16.msra.mxu0 %v2576_v23  ;;  %2402 = vmatpush3.bf16.msra.mxu1 %v2577_v24 }
 0x12d   : > { %943 = vmatprep.subr.bf16.mxu0 %v2578_v25  ;;  %2403 = vmatprep.subr.bf16.mxu1 %v2991_v4 }
 0x130   : > { %944 = vmatpush1.bf16.msra.mxu0 %v2580_v27  ;;  %2404 = vmatpush3.bf16.msra.mxu1 %v2581_v28 }
 0x131   : > { %945 = vmatprep.subr.bf16.mxu0 %v2582_v29  ;;  %2405 = vmatprep.subr.bf16.mxu1 %v2991_v4 }
 0x134   : > { %946 = vmatpush1.bf16.msra.mxu0 %v2584_v30  ;;  %2406 = vmatpush3.bf16.msra.mxu1 %v2585_v31  ;;  %v2596_v30 = vld [vmem:[%s3430_s22 + $0x4] ss:$16 sps:$4 sm:$0xff]   ;;  %v2597_v31 = vld [vmem:[%s3430_s22 + $0x8] ss:$16 sps:$4 sm:$0xff]  }
 0x135   : > { %2411 = vmatprep.subr.bf16.mxu1 %v2991_v4  ;;  %2423 = vmatprep.subr.bf16.mxu0 %v2991_v4 }
 0x1a7   : > { %v745_v10 = vpop.xlane.xlu0 %744 }
 0x1a8   : > { %v747_v11 = vmul.f32 0.0078125, %v745_v10 }
 0x1aa   : > { %v748_v12 = vsub.f32 %v3436_v1, %v747_v11 }
 0x1ac   : > { %v749_v13 = vmul.f32 %v748_v12, %v748_v12 }
 0x1ae   : > { %750 = vadd.xlane.f32.xlu0 %v749_v13 }
 0x23b   : > { %v751_v32 = vpop.xlane.xlu0 %750 }
 0x23c   : > { %v752_v33 = vmul.f32 0.0078125, %v751_v32  ;;  %v2599_v32 = vld [vmem:[%s3430_s22 + $0xc] ss:$16 sps:$4 sm:$0xff]  }
 0x23e   : > { %v753_v34 = vadd.f32 1e-05, %v752_v33  ;;  %v2602_v33 = vld [vmem:[%s3430_s22 + $0x24] ss:$16 sps:$4 sm:$0xff]  }
 0x240   : > { %2674 = vrsqrt.f32 %v753_v34  ;;  %v2605_v34 = vld [vmem:[%s3430_s22 + $0x2c] ss:$16 sps:$4 sm:$0xff]  }
 0x24a   : > { %v2675_v35 = vpop.eup %2674 }
 0x24b   : > { %v755_v37 = vmul.f32 %v2675_v35, %v748_v12  ;;  %v2600_v35 = vld [vmem:[%s3430_s22 + $0x20] ss:$16 sps:$4 sm:$0xff]  }
 0x24d   : > { %v762_v39 = vmul.f32 %v2216_v36, %v755_v37  ;;  %v2608_v36 = vld [vmem:[%s3430_s22 + $0x44] ss:$16 sps:$4 sm:$0xff]   ;;  %v2611_v37 = vld [vmem:[%s3430_s22 + $0x4c] ss:$16 sps:$4 sm:$0xff]  }
 0x24f   : > { %v769_v40 = vadd.f32 %v2217_v38, %v762_v39  ;;  %v2606_v38 = vld [vmem:[%s3430_s22 + $0x40] ss:$16 sps:$4 sm:$0xff]   ;;  %v2609_v39 = vld [vmem:[%s3430_s22 + $0x48] ss:$16 sps:$4 sm:$0xff]  }
 0x251   : > { %v770_v41 = vpack.c.bf16 %v769_v40, %v769_v40 }
 0x253   : > { %964 = vmatmul.mubr.bf16.vlgmr.msra.gmra.mrb[0].mxu0 %v770_v41  ;;  %2408 = vmatmul.mubr.bf16.vlgmr.msra.gmra.mrb[0].mxu1 %v770_v41 }
 0x254   : > { %2413 = vmatprep.mubr.msk.bf16.mxu1 %vm2993_vm0, %v2991_v4  ;;  %2439 = vmatprep.mubr.msk.bf16.mxu0 %vm2993_vm0, %v2991_v4 }
 0x255   : > { %2424 = vmatpush3.bf16.msra.mxu0 %v2586_v5 }
 0x256   : > { %2425 = vmatprep.subr.bf16.mxu0 %v2991_v4 }
 0x259   : > { %2426 = vmatpush3.bf16.msra.mxu0 %v2587_v6 }
 0x25a   : > { %2427 = vmatprep.subr.bf16.mxu0 %v2991_v4 }
 0x25d   : > { %2428 = vmatpush3.bf16.msra.mxu0 %v2588_v7 }
 0x25e   : > { %2429 = vmatprep.subr.bf16.mxu0 %v2991_v4 }
 0x261   : > { %2430 = vmatpush3.bf16.msra.mxu0 %v2589_v8 }
 0x262   : > { %2431 = vmatprep.subr.bf16.mxu0 %v2991_v4 }
 0x265   : > { %2432 = vmatpush3.bf16.msra.mxu0 %v2590_v9  ;;  %v2253_v9 = vld [vmem:[%s3703_s15] ss:$0 sm:$0xff] }
 0x266   : > { %2433 = vmatprep.subr.bf16.mxu0 %v2991_v4 }
 0x269   : > { %2434 = vmatpush3.bf16.msra.mxu0 %v2591_v14  ;;  %v2643_v14 = vld [vmem:[%s3394_s17 + $0xc0] sm:$0xff]  }
 0x26a   : > { %2435 = vmatprep.subr.bf16.mxu0 %v2991_v4 }
 0x26d   : > { %2436 = vmatpush3.bf16.msra.mxu0 %v2592_v15  ;;  %v2644_v15 = vld [vmem:[%s3394_s17] sm:$0xff]  }
 0x26e   : > { %2437 = vmatprep.subr.bf16.mxu0 %v2991_v4 }
 0x271   : > { %2438 = vmatpush3.bf16.msra.mxu0 %v2593_v16  ;;  %v2645_v16 = vld [vmem:[%s3394_s17 + $0x80] sm:$0xff]  }
 0x272   : > { %1517 = vmatprep.subr.bf16.mxu0 %v2599_v32  ;;  %v2661_v32 = vld [vmem:[%s3394_s17 + $0xa0] sm:$0xff]  }
 0x326   : > { %v965_v42 = vpop.f32.mrb[0].mxu0  ;;  %v1006_v43 = vpop.f32.mrb[0].mxu1 }
 0x327   : > { %v967_v44 = vpop.f32.mrb[1].mxu0  ;;  %v2409_v45 = vpop.f32.mrb[1].mxu1  ;;  %v1017_v51 = vpack.c.bf16 %v1006_v43, %v1006_v43  ;;  %v1015_v52 = vpack.c.bf16 %v965_v42, %v965_v42 }
 0x328   : > { %v1016_v46 = vpack.c.bf16 %v967_v44, %v967_v44  ;;  %v969_v47 = vpop.f32.mrb[2].mxu0  ;;  %v1009_v48 = vpop.f32.mrb[2].mxu1  ;;  %v2614_v44 = vld [vmem:[%s3430_s22 + $0x64] ss:$16 sps:$4 sm:$0xff]   ;;  %v2617_v45 = vld [vmem:[%s3430_s22 + $0x6c] ss:$16 sps:$4 sm:$0xff]  }
 0x329   : > { %v970_v49 = vpop.f32.mrb[3].mxu0  ;;  %v2410_v50 = vpop.f32.mrb[3].mxu1  ;;  %v1077_v53 = vsel %vm1075_vm1, %v1017_v51, 0  ;;  %v2615_v47 = vld [vmem:[%s3430_s22 + $0x68] ss:$16 sps:$4 sm:$0xff]  }
 0x32a   : > { %2412 = vmatpush3.bf16.xpose.msra.mxu1 %v1016_v46  ;;  %v2612_v46 = vld [vmem:[%s3430_s22 + $0x60] ss:$16 sps:$4 sm:$0xff]   ;;  %v2620_v48 = vld [vmem:[%s3430_s22 + $0x84] ss:$16 sps:$4 sm:$0xff]   ;;  %v2623_v49 = vld [vmem:[%s3430_s22 + $0x8c] ss:$16 sps:$4 sm:$0xff]  }
 0x32b   : > { %2417 = vmatprep.subr.bf16.mxu1 %v2991_v4  ;;  %v2618_v50 = vld [vmem:[%s3430_s22 + $0x80] ss:$16 sps:$4 sm:$0xff]   ;;  %v2621_v51 = vld [vmem:[%s3430_s22 + $0x88] ss:$16 sps:$4 sm:$0xff]  }
 0x331   : > { %2414 = vmatmul.mubr.bf16.vlgmr.msra.gmra.mrb[4].mxu1 %v1015_v52  ;;  %v2626_v52 = vld [vmem:[%s3430_s22 + $0xa4] ss:$16 sps:$4 sm:$0xff]  }
 0x332   : > { %2418 = vmatpush3.bf16.msra.mxu1 %v1077_v53  ;;  %2419 = vmatprep.mubr.msk.bf16.mxu1 %vm2993_vm0, %v2991_v4  ;;  %v2243_v4 = vld [vmem:[%s724_s3] ss:$0 sm:$0xff]  ;;  %v2629_v53 = vld [vmem:[%s3430_s22 + $0xac] ss:$16 sps:$4 sm:$0xff]   ;;  %s3702_s3 = scalar_lea.vmem [#allocation7], %s3365_s8 }
 0x333   : > { %1476 = vmatprep.subr.bf16.mxu1 %v2596_v30  ;;  %v2252_v7 = vld [vmem:[%s3702_s3] ss:$0 sm:$0xff]  ;;  %v2659_v30 = vld [vmem:[%s3394_s17 + $0xe0] sm:$0xff]  }
 0x404   : > { %v1052_v56 = vpop.f32.mrb[4].mxu1 }
 0x405   : > { %v1058_v57 = vsel %vm1014_vm2, %v1052_v56, -1e+30  ;;  %v2415_v58 = vpop.f32.mrb[5].mxu1  ;;  %v2627_v56 = vld [vmem:[%s3430_s22 + $0xa8] ss:$16 sps:$4 sm:$0xff]  }
 0x406   : > { %v1055_v59 = vpop.f32.mrb[6].mxu1  ;;  %v1060_v60 = vsel %vm1059_vm3, %v1058_v57, -inf  ;;  %v2635_v58 = vld [vmem:[%s3430_s22 + $0xcc] ss:$16 sps:$4 sm:$0xff]  }
 0x407   : > { %1061 = vmax.xlane.f32.xlu1 %v1060_v60  ;;  %v2416_v61 = vpop.f32.mrb[7].mxu1  ;;  %v2630_v59 = vld [vmem:[%s3430_s22 + $0xc0] ss:$16 sps:$4 sm:$0xff]   ;;  %v2633_v60 = vld [vmem:[%s3430_s22 + $0xc8] ss:$16 sps:$4 sm:$0xff]  }
 0x408   : > { %v2638_v61 = vld [vmem:[%s3430_s22 + $0xe4] ss:$16 sps:$4 sm:$0xff]  }
 0x494   : > { %v1062_v62 = vpop.xlane.xlu1 %1061 }
 0x495   : > { %v1063_v63 = vsub.f32 %v1058_v57, %v1062_v62  ;;  %v2632_v57 = vld [vmem:[%s3430_s22 + $0xc4] ss:$16 sps:$4 sm:$0xff]   ;;  %v2636_v62 = vld [vmem:[%s3430_s22 + $0xe0] ss:$16 sps:$4 sm:$0xff]  }
 0x497   : > { %v1064_v0 = vmul.f32 1.442695, %v1063_v63  ;;  %v2639_v63 = vld [vmem:[%s3430_s22 + $0xe8] ss:$16 sps:$4 sm:$0xff]  }
 0x499   : > { %2676 = vpow2.f32 %v1064_v0  ;;  %v2641_v0 = vld [vmem:[%s3430_s22 + $0xec] ss:$16 sps:$4 sm:$0xff]  }
 0x4a3   : > { %v2677_v2 = vpop.eup %2676 }
 0x4a4   : > { %v1066_v3 = vsel %vm1059_vm3, %v2677_v2, 0.0 }
 0x4a5   : > { %1067 = vadd.xlane.f32.xlu1 %v1066_v3 }
 0x532   : > { %v1068_v10 = vpop.xlane.xlu1 %1067 }
 0x533   : > { %2678 = vrcp.f32 %v1068_v10 }
 0x53d   : > { %v2679_v11 = vpop.eup %2678 }
 0x53e   : > { %v1070_v12 = vmul.f32 %v2679_v11, %v2677_v2 }
 0x540   : > { %v1071_v13 = vpack.c.bf16 %v1070_v12, %v1070_v12 }
 0x542   : > { %2420 = vmatmul.mubr.msk.bf16.vlgmr.msra.gmra.mrb[8].mxu1 %vm1059_vm3, %v1071_v13  ;;  %v2642_v13 = vld [vmem:[%s3394_s17 + $0x40] sm:$0xff]  }
 0x543   : > { %1508 = vmatprep.mubr.bf16.mxu1 %v2992_v26 }
 0x615   : > { %v1113_v17 = vpop.f32.mrb[8].mxu1 }
 0x616   : > { %v1119_v18 = vpack.c.bf16 %v1113_v17, %v1113_v17  ;;  %v2421_v19 = vpop.f32.mrb[9].mxu1  ;;  %v2646_v17 = vld [vmem:[%s3394_s17 + $0x48] sm:$0xff]  }
 0x617   : > { %v1116_v20 = vpop.f32.mrb[10].mxu1  ;;  %v2648_v19 = vld [vmem:[%s3394_s17 + $0x8] sm:$0xff]  }
 0x618   : > { %1120 = vst [vmem:[#allocation2] sm:$0xf] %v1119_v18  ;;  %v2422_v21 = vpop.f32.mrb[11].mxu1  ;;  %v2647_v18 = vld [vmem:[%s3394_s17 + $0xc8] sm:$0xff]  }
 0x619   : > { %v2649_v20 = vld [vmem:[%s3394_s17 + $0x88] sm:$0xff]   ;;  %v2650_v21 = vld [vmem:[%s3394_s17 + $0x50] sm:$0xff]  }
 0x61f   : > { %v1121_v22 = vld [vmem:[#allocation2] sm:$0xf] }
 0x620   : > { %2440 = vmatmul.mubr.bf16.vlgmr.msra.gmra.mrb[4].mxu0 %v1121_v22  ;;  %v2651_v22 = vld [vmem:[%s3394_s17 + $0xd0] sm:$0xff]  }
 0x621   : > { %1549 = vmatprep.mubr.bf16.mxu0 %v2992_v26  ;;  %v2594_v26 = vld [vmem:[%s3430_s22] ss:$16 sps:$4 sm:$0xff]   ;;  %1518 = vmatpush1.bf16.msra.mxu0 %v2597_v31 }
 0x622   : > { %1477 = vmatpush1.bf16.msra.mxu1 %v2594_v26  ;;  %1519 = vmatprep.subr.bf16.mxu0 %v2605_v34  ;;  %v2658_v26 = vld [vmem:[%s3394_s17 + $0x60] sm:$0xff]   ;;  %v2663_v34 = vld [vmem:[%s3394_s17 + $0xe8] sm:$0xff]  }
 0x623   : > { %1478 = vmatprep.subr.bf16.mxu1 %v2602_v33  ;;  %v2660_v31 = vld [vmem:[%s3394_s17 + $0x20] sm:$0xff]   ;;  %v2662_v33 = vld [vmem:[%s3394_s17 + $0x68] sm:$0xff]  }
 0x626   : > { %1479 = vmatpush1.bf16.msra.mxu1 %v2600_v35  ;;  %v2664_v35 = vld [vmem:[%s3394_s17 + $0x28] sm:$0xff]  }
 0x627   : > { %1480 = vmatprep.subr.bf16.mxu1 %v2608_v36  ;;  %v2666_v36 = vld [vmem:[%s3394_s17 + $0x70] sm:$0xff]  }
 0x62a   : > { %1481 = vmatpush1.bf16.msra.mxu1 %v2606_v38  ;;  %v2668_v38 = vld [vmem:[%s3394_s17 + $0x30] sm:$0xff]  }
 0x62b   : > { %1482 = vmatprep.subr.bf16.mxu1 %v2614_v44  ;;  %v1297_v44 = vshrl.u32 %v1012_v54, 7 }
 0x62e   : > { %1483 = vmatpush1.bf16.msra.mxu1 %v2612_v46  ;;  %v1306_v46 = vsub.s32 2, %v1297_v44 }
 0x62f   : > { %1484 = vmatprep.subr.bf16.mxu1 %v2620_v48  ;;  %v1302_v48 = vsub.s32 1, %v1297_v44 }
 0x632   : > { %1485 = vmatpush1.bf16.msra.mxu1 %v2618_v50 }
 0x633   : > { %1486 = vmatprep.subr.bf16.mxu1 %v2626_v52 }
 0x636   : > { %1487 = vmatpush1.bf16.msra.mxu1 %v2624_v55 }
 0x637   : > { %1488 = vmatprep.subr.bf16.mxu1 %v2632_v57 }
 0x63a   : > { %1489 = vmatpush1.bf16.msra.mxu1 %v2630_v59 }
 0x63b   : > { %1490 = vmatprep.subr.bf16.mxu1 %v2638_v61 }
 0x63e   : > { %1491 = vmatpush1.bf16.msra.mxu1 %v2636_v62 }
 0x63f   : > { %2347 = vmatprep.subr.bf16.mxu1 %v2642_v13 }
 0x6f3   : > { %v1227_v23 = vpop.f32.mrb[4].mxu0 }
 0x6f4   : > { %v1228_v24 = vadd.f32 %v2243_v4, %v1227_v23  ;;  %v2441_v25 = vpop.f32.mrb[5].mxu0  ;;  %v2652_v4 = vld [vmem:[%s3394_s17 + $0x10] sm:$0xff]  }
 0x6f5   : > { %v1230_v27 = vpop.f32.mrb[6].mxu0  ;;  %v2653_v23 = vld [vmem:[%s3394_s17 + $0x90] sm:$0xff]   ;;  %v2655_v25 = vld [vmem:[%s3394_s17 + $0xd8] sm:$0xff]  }
 0x6f6   : > { %v3521_v28 = vadd.f32 %v1228_v24, %v3436_v1  ;;  %v2442_v29 = vpop.f32.mrb[7].mxu0  ;;  %v2603_v1 = vld [vmem:[%s3430_s22 + $0x28] ss:$16 sps:$4 sm:$0xff]  }
 0x6f7   : > { %1520 = vmatpush1.bf16.msra.mxu0 %v2603_v1  ;;  %v2654_v24 = vld [vmem:[%s3394_s17 + $0x58] sm:$0xff]   ;;  %v2665_v1 = vld [vmem:[%s3394_s17 + $0xa8] sm:$0xff]  }
 0x6f8   : > { %1236 = vadd.xlane.f32.xlu0 %v3521_v28  ;;  %1521 = vmatprep.subr.bf16.mxu0 %v2611_v37  ;;  %v2656_v27 = vld [vmem:[%s3394_s17 + $0x18] sm:$0xff]   ;;  %v2667_v37 = vld [vmem:[%s3394_s17 + $0xf0] sm:$0xff]  }
 0x6f9   : > { %v2657_v29 = vld [vmem:[%s3394_s17 + $0x98] sm:$0xff]  }
 0x6fb   : > { %1522 = vmatpush1.bf16.msra.mxu0 %v2609_v39  ;;  %v2669_v39 = vld [vmem:[%s3394_s17 + $0xb0] sm:$0xff]  }
 0x6fc   : > { %1523 = vmatprep.subr.bf16.mxu0 %v2617_v45  ;;  %v1298_v45 = vsub.s32 0, %v1297_v44 }
 0x6ff   : > { %1524 = vmatpush1.bf16.msra.mxu0 %v2615_v47  ;;  %v1294_v47 = vld [vmem:[%s3392_s12] sm:$0xf] }
 0x700   : > { %1525 = vmatprep.subr.bf16.mxu0 %v2623_v49  ;;  %v1310_v49 = vsub.s32 3, %v1297_v44  ;;  %v1299_v50 = vrot.slane %v1294_v47, %v1298_v45  ;;  %v1303_v52 = vrot.slane %v1294_v47, %v1302_v48  ;;  %v2286_v45 = vld [vmem:[%s627_s1] ss:$0 sm:$0xff] }
 0x703   : > { %1526 = vmatpush1.bf16.msra.mxu0 %v2621_v51  ;;  %v1307_v51 = vrot.slane %v1294_v47, %v1306_v46 }
 0x704   : > { %1527 = vmatprep.subr.bf16.mxu0 %v2629_v53  ;;  %v1311_v53 = vrot.slane %v1294_v47, %v1310_v49 }
 0x707   : > { %1528 = vmatpush1.bf16.msra.mxu0 %v2627_v56 }
 0x708   : > { %1529 = vmatprep.subr.bf16.mxu0 %v2635_v58 }
 0x70b   : > { %1530 = vmatpush1.bf16.msra.mxu0 %v2633_v60 }
 0x70c   : > { %1531 = vmatprep.subr.bf16.mxu0 %v2641_v0 }
 0x70f   : > { %1532 = vmatpush1.bf16.msra.mxu0 %v2639_v63 }
 0x710   : > { %2369 = vmatprep.subr.bf16.mxu0 %v2643_v14 }
 0x785   : > { %v1237_v40 = vpop.xlane.xlu0 %1236 }
 0x786   : > { %v1238_v41 = vmul.f32 0.0078125, %v1237_v40  ;;  %v2670_v40 = vld [vmem:[%s3394_s17 + $0x78] sm:$0xff]  }
 0x788   : > { %v1239_v42 = vsub.f32 %v3521_v28, %v1238_v41  ;;  %v2671_v41 = vld [vmem:[%s3394_s17 + $0xf8] sm:$0xff]  }
 0x78a   : > { %v1240_v43 = vmul.f32 %v1239_v42, %v1239_v42 }
 0x78c   : > { %1241 = vadd.xlane.f32.xlu1 %v1240_v43  ;;  %v2673_v43 = vld [vmem:[%s3394_s17 + $0xb8] sm:$0xff]  }
 0x819   : > { %v1242_v2 = vpop.xlane.xlu1 %1241 }
 0x81a   : > { %v1243_v3 = vmul.f32 0.0078125, %v1242_v2 }
 0x81c   : > { %v1244_v5 = vadd.f32 1e-05, %v1243_v3 }
 0x81e   : > { %2680 = vrsqrt.f32 %v1244_v5 }
 0x828   : > { %v2681_v6 = vpop.eup %2680 }
 0x829   : > { %v1246_v8 = vmul.f32 %v2681_v6, %v1239_v42  ;;  %v2672_v42 = vld [vmem:[%s3394_s17 + $0x38] sm:$0xff]  }
 0x82b   : > { %v1253_v10 = vmul.f32 %v2252_v7, %v1246_v8 }
 0x82d   : > { %v1260_v11 = vadd.f32 %v2253_v9, %v1253_v10 }
 0x82f   : > { %v1261_v12 = vpack.c.bf16 %v1260_v11, %v1260_v11 }
 0x831   : > { %1509 = vmatmul.mubr.bf16.vlgmr.msra.gmra.mrb[12].mxu1 %v1261_v12  ;;  %1550 = vmatmul.mubr.bf16.vlgmr.msra.gmra.mrb[8].mxu0 %v1261_v12 }
 0x832   : > { %2348 = vmatpush3.bf16.msra.mxu1 %v2644_v15  ;;  %2370 = vmatpush3.bf16.msra.mxu0 %v2645_v16 }
 0x833   : > { %2349 = vmatprep.subr.bf16.mxu1 %v2646_v17  ;;  %2371 = vmatprep.subr.bf16.mxu0 %v2647_v18 }
 0x836   : > { %2350 = vmatpush3.bf16.msra.mxu1 %v2648_v19  ;;  %2372 = vmatpush3.bf16.msra.mxu0 %v2649_v20 }
 0x837   : > { %2351 = vmatprep.subr.bf16.mxu1 %v2650_v21  ;;  %2373 = vmatprep.subr.bf16.mxu0 %v2651_v22 }
 0x83a   : > { %2352 = vmatpush3.bf16.msra.mxu1 %v2652_v4  ;;  %2374 = vmatpush3.bf16.msra.mxu0 %v2653_v23 }
 0x83b   : > { %2353 = vmatprep.subr.bf16.mxu1 %v2654_v24  ;;  %2375 = vmatprep.subr.bf16.mxu0 %v2655_v25 }
 0x83e   : > { %2354 = vmatpush3.bf16.msra.mxu1 %v2656_v27  ;;  %2376 = vmatpush3.bf16.msra.mxu0 %v2657_v29 }
 0x83f   : > { %2355 = vmatprep.subr.bf16.mxu1 %v2658_v26  ;;  %2377 = vmatprep.subr.bf16.mxu0 %v2659_v30 }
 0x842   : > { %2356 = vmatpush3.bf16.msra.mxu1 %v2660_v31  ;;  %2378 = vmatpush3.bf16.msra.mxu0 %v2661_v32 }
 0x843   : > { %2357 = vmatprep.subr.bf16.mxu1 %v2662_v33  ;;  %2379 = vmatprep.subr.bf16.mxu0 %v2663_v34 }
 0x846   : > { %2358 = vmatpush3.bf16.msra.mxu1 %v2664_v35  ;;  %2380 = vmatpush3.bf16.msra.mxu0 %v2665_v1 }
 0x847   : > { %2359 = vmatprep.subr.bf16.mxu1 %v2666_v36  ;;  %2381 = vmatprep.subr.bf16.mxu0 %v2667_v37 }
 0x84a   : > { %2360 = vmatpush3.bf16.msra.mxu1 %v2668_v38  ;;  %2382 = vmatpush3.bf16.msra.mxu0 %v2669_v39 }
 0x84b   : > { %2361 = vmatprep.subr.bf16.mxu1 %v2670_v40  ;;  %2383 = vmatprep.subr.bf16.mxu0 %v2671_v41 }
 0x84e   : > { %2362 = vmatpush3.bf16.msra.mxu1 %v2672_v42  ;;  %2384 = vmatpush3.bf16.msra.mxu0 %v2673_v43 }
 0x904   : > { %v1510_v55 = vpop.f32.mrb[12].mxu1  ;;  %v1551_v56 = vpop.f32.mrb[8].mxu0 }
 0x905   : > { %v1511_v57 = vadd.f32 %v1510_v55, %v1299_v50  ;;  %v1552_v58 = vadd.f32 %v1551_v56, %v1307_v51  ;;  %v1512_v59 = vpop.f32.mrb[13].mxu1  ;;  %v1553_v60 = vpop.f32.mrb[9].mxu0 }
 0x906   : > { %v1513_v61 = vadd.f32 %v1512_v59, %v1303_v52  ;;  %v1554_v62 = vadd.f32 %v1553_v60, %v1311_v53  ;;  %v1514_v63 = vpop.f32.mrb[14].mxu1  ;;  %v1555_v0 = vpop.f32.mrb[10].mxu0 }
 0x907   : > { %v1562_v54 = vmul.f32 0.044715, %v1511_v57  ;;  %v1564_v2 = vmul.f32 0.044715, %v1552_v58  ;;  %v1515_v3 = vpop.f32.mrb[15].mxu1  ;;  %v1556_v5 = vpop.f32.mrb[11].mxu0 }
 0x908   : > { %v1563_v6 = vmul.f32 0.044715, %v1513_v61  ;;  %v1565_v7 = vmul.f32 0.044715, %v1554_v62  ;;  %v1558_v25 = vmul.f32 0.5, %v1511_v57  ;;  %v1559_v26 = vmul.f32 0.5, %v1513_v61 }
 0x909   : > { %v1566_v8 = vmul.f32 %v1562_v54, %v1511_v57  ;;  %v1568_v9 = vmul.f32 %v1564_v2, %v1552_v58  ;;  %v1561_v32 = vmul.f32 0.5, %v1554_v62  ;;  %v1560_v1 = vmul.f32 0.5, %v1552_v58 }
 0x90a   : > { %v1567_v10 = vmul.f32 %v1563_v6, %v1513_v61  ;;  %v1569_v11 = vmul.f32 %v1565_v7, %v1554_v62 }
 0x90b   : > { %v1570_v12 = vmul.f32 %v1566_v8, %v1511_v57  ;;  %v1572_v13 = vmul.f32 %v1568_v9, %v1552_v58 }
 0x90c   : > { %v1571_v14 = vmul.f32 %v1567_v10, %v1513_v61  ;;  %v1573_v15 = vmul.f32 %v1569_v11, %v1554_v62 }
 0x90d   : > { %v1574_v16 = vadd.f32 %v1570_v12, %v1511_v57  ;;  %v1576_v17 = vadd.f32 %v1572_v13, %v1552_v58 }
 0x90e   : > { %v1575_v18 = vadd.f32 %v1571_v14, %v1513_v61  ;;  %v1577_v19 = vadd.f32 %v1573_v15, %v1554_v62 }
 0x90f   : > { %v1578_v20 = vmul.f32 0.7978846, %v1574_v16  ;;  %v1580_v4 = vmul.f32 0.7978846, %v1576_v17 }
 0x910   : > { %v1579_v21 = vmul.f32 0.7978846, %v1575_v18  ;;  %v1581_v22 = vmul.f32 0.7978846, %v1577_v19 }
 0x911   : > { %2682 = vtanh.f32 %v1578_v20 }
 0x912   : > { %2684 = vtanh.f32 %v1579_v21 }
 0x913   : > { %2686 = vtanh.f32 %v1581_v22 }
 0x914   : > { %2688 = vtanh.f32 %v1580_v4 }
 0x91b   : > { %v2683_v23 = vpop.eup %2682 }
 0x91c   : > { %v2685_v24 = vpop.eup %2684  ;;  %v1586_v27 = vadd.f32 1.0, %v2683_v23 }
 0x91d   : > { %v2687_v29 = vpop.eup %2686  ;;  %v1587_v30 = vadd.f32 1.0, %v2685_v24 }
 0x91e   : > { %v2689_v31 = vpop.eup %2688  ;;  %v1589_v33 = vadd.f32 1.0, %v2687_v29  ;;  %v1590_v34 = vmul.f32 %v1586_v27, %v1558_v25 }
 0x91f   : > { %v1591_v35 = vmul.f32 %v1587_v30, %v1559_v26  ;;  %v1588_v36 = vadd.f32 1.0, %v2689_v31 }
 0x920   : > { %v1593_v37 = vmul.f32 %v1589_v33, %v1561_v32  ;;  %v1594_v41 = vpack.c.bf16 %v1590_v34, %v1590_v34 }
 0x921   : > { %v1595_v38 = vpack.c.bf16 %v1591_v35, %v1591_v35  ;;  %v1592_v39 = vmul.f32 %v1588_v36, %v1560_v1 }
 0x922   : > { %v1597_v40 = vpack.c.bf16 %v1593_v37, %v1593_v37 }
 0x923   : > { %1893 = vmatprep.mubr.bf16.mxu1 %v1595_v38  ;;  %v1596_v42 = vpack.c.bf16 %v1592_v39, %v1592_v39 }
 0x924   : > { %1933 = vmatprep.mubr.bf16.mxu0 %v1597_v40  ;;  %1894 = vmatmul.mubr.bf16.vlgmr.msra.gmra.mrb[16].mxu1 %v1594_v41 }
 0x925   : > { %1934 = vmatmul.mubr.bf16.vlgmr.msra.gmra.mrb[12].mxu0 %v1596_v42 }
 0x9f7   : > { %v2363_v43 = vpop.f32.mrb[16].mxu1 }
 0x9f8   : > { %v2385_v44 = vpop.f32.mrb[12].mxu0  ;;  %v2364_v46 = vpop.f32.mrb[17].mxu1 }
 0x9f9   : > { %v2365_v47 = vadd.f32 %v2364_v46, %v2363_v43  ;;  %v2386_v48 = vpop.f32.mrb[13].mxu0  ;;  %v2366_v49 = vpop.f32.mrb[18].mxu1 }
 0x9fa   : > { %v2387_v50 = vadd.f32 %v2386_v48, %v2385_v44  ;;  %v2388_v51 = vpop.f32.mrb[14].mxu0  ;;  %v2367_v52 = vpop.f32.mrb[19].mxu1 }
 0x9fb   : > { %v1896_v53 = vadd.f32 %v2365_v47, %v2286_v45  ;;  %v2389_v55 = vpop.f32.mrb[15].mxu0 }
 0x9fd   : > { %v1936_v56 = vadd.f32 %v2387_v50, %v1896_v53 }
 0x9ff   : > { %v1941_v57 = vadd.f32 %v1936_v56, %v3521_v28 }
 0xa01   : > { %1942 = vst [vmem:[%s3425_s26] sm:$0xff] %v1941_v57 }
 0xa02 PF: > { %s34_s28 = sadd.s32 1, %s2978_s28   ;;  %s3704_s21 = sld [smem:[#allocation18_spill]] }
 0xa03   : > { %p31_p5 = scmp.ge.s32.totalorder %s34_s28, 6   ;;  %s3705_s22 = sld [smem:[#allocation19_spill]] }
 0xa04   : > { %s3706_s23 = sld [smem:[#allocation24_spill]]  ;;  %s3707_s24 = sld [smem:[#allocation20_spill]] }
 0xa05   : > { %s3708_s25 = sld [smem:[#allocation21_spill]]  ;;  %s3709_s26 = sld [smem:[#allocation22_spill]] }
 0xa06   : > { %s3710_s27 = sld [smem:[#allocation23_spill]]  ;;  %33 = sbr.rel (!%p31_p5) target bundleno = 25 (0x19), region = 199 }
 0xa0d   :  { %1962 = vsyncpa [#allocation4], 1 }
 0xa0e   :  { %1964 = vsyncpa [#allocation4 + $0x1], 1 }
 0xa0f   :  { %1965 = vsyncpa [#allocation6], 1 }
 0xa10   :  { %1967 = vsyncpa [#allocation6 + $0x1], 1 }
 0xa11   :  { %1968 = vsyncpa [#allocation9], 1 }
 0xa12   :  { %1970 = vsyncpa [#allocation9 + $0x1], 1 }
 0xa13   :  { %1971 = vsyncpa [#allocation12], 1 }
 0xa14   :  { %1973 = vsyncpa [#allocation12 + $0x1], 1 }

</bundles_post_ra>
